<compile_context>
chip_gen: v5e
topology: v5e:2x2
jax: 0.10.0
libtpu: 0.0.40
codegen_flags: <defaults>
</compile_context>

<pallas_src>
import jax
import jax.numpy as jnp
from jax.experimental import pallas as pl
from jax.experimental.pallas import tpu as pltpu

EPS = 1e-5


def bn_relu_kernel(x_ref, gb_ref, o_ref):
    # x_ref : (N, Cb, HW)  -- HW on the lane axis, channels on sublanes
    # gb_ref: (2, Cb, 1)   -- gamma stacked over beta
    # o_ref : (N, Cb, HW)
    n, cb, hw = x_ref.shape
    inv_m = 1.0 / float(n * hw)

    ones = jnp.ones((hw, 1), jnp.float32)

    # ---- pass 1: per-channel mean via MXU (keeps the XLU free) -------------
    s = jnp.zeros((cb, 1), jnp.float32)
    for b in range(n):
        xb = x_ref[b].astype(jnp.float32)                       # (Cb, HW)
        s = s + jnp.dot(xb, ones, preferred_element_type=jnp.float32)
    mean = s * inv_m                                             # (Cb, 1)

    # ---- pass 2: centered variance (numerically safe) ----------------------
    sq = jnp.zeros((cb, 1), jnp.float32)
    for b in range(n):
        d = x_ref[b].astype(jnp.float32) - mean                  # (Cb, HW)
        sq = sq + jnp.dot(d * d, ones, preferred_element_type=jnp.float32)
    var = sq * inv_m
    inv_std = jax.lax.rsqrt(var + EPS)

    # Fold affine into a single per-channel scale/shift.
    scale = gb_ref[0] * inv_std                                  # (Cb, 1)
    shift = gb_ref[1] - mean * scale                             # (Cb, 1)

    # ---- pass 3: normalize + ReLU; re-read x to bound live ranges ----------
    for b in range(n):
        xb = x_ref[b].astype(jnp.float32)
        o_ref[b] = jnp.maximum(xb * scale + shift, 0.0).astype(o_ref.dtype)


def _pick_c_block(C, target=144):
    """Largest divisor of C that is a multiple of 8 and <= target (fallback C)."""
    if C % 8 != 0:
        return C
    best = None
    for cand in range(8, min(target, C) + 1, 8):
        if C % cand == 0:
            best = cand
    return best if best is not None else C


def batchnorm_relu(x_nchw, gamma, beta):
    """x_nchw: (N, C, H, W) float32; gamma/beta: (C,) float32."""
    N, C, H, W = x_nchw.shape
    HW = H * W

    c_blk = _pick_c_block(C)
    n_blocks = C // c_blk

    # Free views / tiny packing (no transpose of the activation).
    x3d = x_nchw.reshape(N, C, HW)
    gb = jnp.stack([gamma, beta]).reshape(2, C, 1)

    out3d = pl.pallas_call(
        bn_relu_kernel,
        out_shape=jax.ShapeDtypeStruct((N, C, HW), x_nchw.dtype),
        grid=(n_blocks,),
        in_specs=[
            pl.BlockSpec((N, c_blk, HW), lambda i: (0, i, 0)),
            pl.BlockSpec((2, c_blk, 1), lambda i: (0, i, 0)),
        ],
        out_specs=pl.BlockSpec((N, c_blk, HW), lambda i: (0, i, 0)),
        compiler_params=pltpu.CompilerParams(
            dimension_semantics=("parallel",),
        ),
    )(x3d, gb)

    return out3d.reshape(N, C, H, W)


def reference(x_nchw, gamma, beta):
    mean = jnp.mean(x_nchw, axis=(0, 2, 3), keepdims=True)
    var = jnp.mean((x_nchw - mean) ** 2, axis=(0, 2, 3), keepdims=True)
    y = (x_nchw - mean) / jnp.sqrt(var + EPS)
    y = y * gamma.reshape(1, -1, 1, 1) + beta.reshape(1, -1, 1, 1)
    return jnp.maximum(y, 0.0)


if __name__ == "__main__":
    key = jax.random.PRNGKey(0)
    k_x, k_g, k_b = jax.random.split(key, 3)

    N, C, H, W = 1, 576, 14, 14  # matches the module's expected input

    x = jax.random.normal(k_x, (N, C, H, W), dtype=jnp.float32)
    # exercise the affine path (PyTorch default init is weight=1, bias=0)
    gamma = 1.0 + 0.1 * jax.random.normal(k_g, (C,), dtype=jnp.float32)
    beta = 0.1 * jax.random.normal(k_b, (C,), dtype=jnp.float32)

    out = batchnorm_relu(x, gamma, beta)
    out = jax.block_until_ready(out)

    ref = reference(x, gamma, beta)
    assert out.shape == (N, C, H, W)
    assert jnp.max(jnp.abs(out - ref)) < 1e-4

    print("KERNEL_OK")
</pallas_src>

<mosaic_0001>
module attributes {stable_mosaic.version = 11 : i64} {
  func.func @bn_relu_kernel(%arg0: i32, %arg1: memref<1x144x196xf32, #tpu.memory_space<vmem>>, %arg2: memref<2x144x1xf32, #tpu.memory_space<vmem>>, %arg3: memref<1x144x196xf32, #tpu.memory_space<vmem>>) attributes {dimension_semantics = [#tpu.dimension_semantics<parallel>], iteration_bounds = array<i64: 4>, scalar_prefetch = 0 : i64, scratch_operands = 0 : i64, tpu.core_type = #tpu.core_type<tc>, window_params = [{transform_indices = @transform_0, window_bounds = array<i64: 1, 144, 196>}, {transform_indices = @transform_1, window_bounds = array<i64: 2, 144, 1>}, {transform_indices = @transform_2, window_bounds = array<i64: 1, 144, 196>}]} {
    %cst = arith.constant 1.000000e+00 : f32
    %0 = vector.broadcast %cst : f32 to vector<196x1xf32>
    %cst_0 = arith.constant 0.000000e+00 : f32
    %1 = vector.broadcast %cst_0 : f32 to vector<144x1xf32>
    %c0 = arith.constant 0 : index
    %c0_1 = arith.constant 0 : index
    %c0_2 = arith.constant 0 : index
    %2 = vector.load %arg1[%c0, %c0_1, %c0_2] : memref<1x144x196xf32, #tpu.memory_space<vmem>>, vector<1x144x196xf32>
    %3 = vector.shape_cast %2 : vector<1x144x196xf32> to vector<144x196xf32>
    %cst_3 = arith.constant dense<0.000000e+00> : vector<144x1xf32>
    %4 = tpu.matmul %3, %0, %cst_3 {dimension_numbers = #tpu.dot_dimension_numbers<[1], [0], [0], [1], [0, 0, 1, 1], [], []>} : vector<144x196xf32>, vector<196x1xf32>, vector<144x1xf32> -> vector<144x1xf32>
    %5 = arith.addf %1, %4 : vector<144x1xf32>
    %cst_4 = arith.constant 0.00510204071 : f32
    %6 = vector.broadcast %cst_4 : f32 to vector<144x1xf32>
    %7 = arith.mulf %5, %6 : vector<144x1xf32>
    %cst_5 = arith.constant 0.000000e+00 : f32
    %8 = vector.broadcast %cst_5 : f32 to vector<144x1xf32>
    %c0_6 = arith.constant 0 : index
    %c0_7 = arith.constant 0 : index
    %c0_8 = arith.constant 0 : index
    %9 = vector.load %arg1[%c0_6, %c0_7, %c0_8] : memref<1x144x196xf32, #tpu.memory_space<vmem>>, vector<1x144x196xf32>
    %10 = vector.shape_cast %9 : vector<1x144x196xf32> to vector<144x196xf32>
    %11 = vector.broadcast %7 : vector<144x1xf32> to vector<144x196xf32>
    %12 = arith.subf %10, %11 : vector<144x196xf32>
    %13 = arith.mulf %12, %12 : vector<144x196xf32>
    %cst_9 = arith.constant dense<0.000000e+00> : vector<144x1xf32>
    %14 = tpu.matmul %13, %0, %cst_9 {dimension_numbers = #tpu.dot_dimension_numbers<[1], [0], [0], [1], [0, 0, 1, 1], [], []>} : vector<144x196xf32>, vector<196x1xf32>, vector<144x1xf32> -> vector<144x1xf32>
    %15 = arith.addf %8, %14 : vector<144x1xf32>
    %cst_10 = arith.constant 0.00510204071 : f32
    %16 = vector.broadcast %cst_10 : f32 to vector<144x1xf32>
    %17 = arith.mulf %15, %16 : vector<144x1xf32>
    %cst_11 = arith.constant 9.99999974E-6 : f32
    %18 = vector.broadcast %cst_11 : f32 to vector<144x1xf32>
    %19 = arith.addf %17, %18 : vector<144x1xf32>
    %20 = math.rsqrt %19 : vector<144x1xf32>
    %c0_12 = arith.constant 0 : index
    %c0_13 = arith.constant 0 : index
    %c0_14 = arith.constant 0 : index
    %21 = vector.load %arg2[%c0_12, %c0_13, %c0_14] : memref<2x144x1xf32, #tpu.memory_space<vmem>>, vector<1x144x1xf32>
    %22 = vector.shape_cast %21 : vector<1x144x1xf32> to vector<144x1xf32>
    %23 = arith.mulf %22, %20 : vector<144x1xf32>
    %c1 = arith.constant 1 : index
    %c0_15 = arith.constant 0 : index
    %c0_16 = arith.constant 0 : index
    %24 = vector.load %arg2[%c1, %c0_15, %c0_16] : memref<2x144x1xf32, #tpu.memory_space<vmem>>, vector<1x144x1xf32>
    %25 = vector.shape_cast %24 : vector<1x144x1xf32> to vector<144x1xf32>
    %26 = arith.mulf %7, %23 : vector<144x1xf32>
    %27 = arith.subf %25, %26 : vector<144x1xf32>
    %c0_17 = arith.constant 0 : index
    %c0_18 = arith.constant 0 : index
    %c0_19 = arith.constant 0 : index
    %28 = vector.load %arg1[%c0_17, %c0_18, %c0_19] : memref<1x144x196xf32, #tpu.memory_space<vmem>>, vector<1x144x196xf32>
    %29 = vector.shape_cast %28 : vector<1x144x196xf32> to vector<144x196xf32>
    %30 = vector.broadcast %23 : vector<144x1xf32> to vector<144x196xf32>
    %31 = arith.mulf %29, %30 : vector<144x196xf32>
    %32 = vector.broadcast %27 : vector<144x1xf32> to vector<144x196xf32>
    %33 = arith.addf %31, %32 : vector<144x196xf32>
    %cst_20 = arith.constant 0.000000e+00 : f32
    %34 = vector.broadcast %cst_20 : f32 to vector<144x196xf32>
    %35 = arith.maximumf %33, %34 : vector<144x196xf32>
    %c0_21 = arith.constant 0 : index
    %c0_22 = arith.constant 0 : index
    %c0_23 = arith.constant 0 : index
    %36 = vector.load %arg3[%c0_21, %c0_22, %c0_23] : memref<1x144x196xf32, #tpu.memory_space<vmem>>, vector<1x144x196xf32>
    %37 = vector.shape_cast %36 : vector<1x144x196xf32> to vector<144x196xf32>
    %38 = vector.shape_cast %35 : vector<144x196xf32> to vector<1x144x196xf32>
    tpu.vector_store %arg3[%c0_21, %c0_22, %c0_23], %38 {strides = array<i32>} : memref<1x144x196xf32, #tpu.memory_space<vmem>>, vector<1x144x196xf32>,
    return
  }
  func.func @transform_0(%arg0: i32) -> (i32, i32, i32) {
    %c0_i32 = arith.constant 0 : i32
    %c0_i32_0 = arith.constant 0 : i32
    %c0_i32_1 = arith.constant 0 : i32
    return %c0_i32, %arg0, %c0_i32_0 : i32, i32, i32
  }
  func.func @transform_1(%arg0: i32) -> (i32, i32, i32) {
    %c0_i32 = arith.constant 0 : i32
    %c0_i32_0 = arith.constant 0 : i32
    %c0_i32_1 = arith.constant 0 : i32
    return %c0_i32, %arg0, %c0_i32_0 : i32, i32, i32
  }
  func.func @transform_2(%arg0: i32) -> (i32, i32, i32) {
    %c0_i32 = arith.constant 0 : i32
    %c0_i32_0 = arith.constant 0 : i32
    %c0_i32_1 = arith.constant 0 : i32
    return %c0_i32, %arg0, %c0_i32_0 : i32, i32, i32
  }
}

</mosaic_0001>

<bundles_post_ra>
// kernel: tpu_custom_call.1
= control target key start
LH: loop header
LB: loop body
LE: loop exit
PB: predicated region body
PF: predicated region fallthrough
CT: control target
= control target key end

     0   :  { %s1884_s9 = smov 0   ;;  %s1886_s10 = smov 0   ;;  %s2457_s0 = inlined_call_operand.vmem [shape: f32[1,576,196], index: 0, kind: input, shape index: {}]   ;;  %s2458_s1 = inlined_call_operand.vmem [shape: f32[2,576,1], index: 1, kind: input, shape index: {}]   ;;  %s2459_s2 = inlined_call_operand.vmem [shape: f32[1,576,196], index: 2, kind: output, shape index: {}]  }
   0x1   :  { %s1888_s11 = smov 0  }
   0x2 LB: > { %s1669_s12 = sadd.s32 4294967295, %s1865_s11   ;;  %s1901_s13 = sadd.s32 1, %s1865_s11   ;;  %s1865_s11 = sphi %s1888_s11, %s2465_s11   ;;  %s1861_s10 = sphi %s1886_s10, %s2464_s10   ;;  %s1857_s9 = sphi %s1884_s9, %s2463_s9  }
   0x3   : > { %s42_s14 = ssub.s32 %s1865_s11, %s1901_s13  ;;  %s45_s15 = sadd.s32 1, %s1861_s10 }
   0x4   : > { %p43_p0 = scmp.eq.s32.totalorder %s42_s14, 0  ;;  %p52_p1 = scmp.ne.s32.totalorder %s1861_s10, %s1857_s9 }
   0x5   : > { %p53_p2 = scmp.eq.s32.totalorder %s1865_s11, 0  ;;  %p1672_p4 = scmp.ge.s32.totalorder %s1865_s11, 4 }
   0x6   : > { %s1910_s16 = scalar_select %p43_p0, %s1861_s10, %s45_s15  }
   0x7   : > { %p54_p3 = por %p53_p2, %p52_p1  ;;  %104 = sbr.rel (%p1672_p4) target bundleno = 53 (0x35), region = 16 }
   0xc   : > { %117 = sbr.rel (!%p54_p3) target bundleno = 53 (0x35), region = 24  ;;  %s119_s17 = sand.u32 (%p54_p3), 1, %s1861_s10  }
   0xd   : > { %s1737_s18 = smul.u32 (%p54_p3), 144, %s1865_s11 }
   0xe   : > { %s1740_s19 = smul.u32 (%p54_p3), 288, %s119_s17 }
   0xf   : > { %s1918_s22 = scalar_lea.vmem (%p54_p3), %s2458_s1, %s1737_s18 }
  0x10   : > { %v223_v0 = vld [vmem:[%s1918_s22] sm:$0xff] (%p54_p3)  ;;  %v225_v1 = vld [vmem:[%s1918_s22 + $0x8] sm:$0xff] (%p54_p3)  ;;  %v227_v2 = vld [vmem:[%s1918_s22 + $0x10] sm:$0xff] (%p54_p3)  ;;  %s1923_s23 = scalar_lea.vmem (%p54_p3), [#allocation2], %s1740_s19 }
  0x11   : > { %224 = vst [vmem:[%s1923_s23] sm:$0xff] %v223_v0  ;;  %v229_v3 = vld [vmem:[%s1918_s22 + $0x18] sm:$0xff]  ;;  %v231_v4 = vld [vmem:[%s1918_s22 + $0x20] sm:$0xff]  ;;  %v233_v5 = vld [vmem:[%s1918_s22 + $0x28] sm:$0xff] }
  0x12   : > { %226 = vst [vmem:[%s1923_s23 + $0x8] sm:$0xff] %v225_v1  ;;  %v235_v6 = vld [vmem:[%s1918_s22 + $0x30] sm:$0xff]  ;;  %v237_v7 = vld [vmem:[%s1918_s22 + $0x38] sm:$0xff]  ;;  %v239_v8 = vld [vmem:[%s1918_s22 + $0x40] sm:$0xff] }
  0x13   : > { %228 = vst [vmem:[%s1923_s23 + $0x10] sm:$0xff] %v227_v2  ;;  %v241_v9 = vld [vmem:[%s1918_s22 + $0x48] sm:$0xff]  ;;  %v243_v10 = vld [vmem:[%s1918_s22 + $0x50] sm:$0xff]  ;;  %v245_v11 = vld [vmem:[%s1918_s22 + $0x58] sm:$0xff] }
  0x14   : > { %230 = vst [vmem:[%s1923_s23 + $0x18] sm:$0xff] %v229_v3  ;;  %v247_v12 = vld [vmem:[%s1918_s22 + $0x60] sm:$0xff]  ;;  %v249_v13 = vld [vmem:[%s1918_s22 + $0x68] sm:$0xff]  ;;  %v251_v14 = vld [vmem:[%s1918_s22 + $0x70] sm:$0xff] }
  0x15   : > { %232 = vst [vmem:[%s1923_s23 + $0x20] sm:$0xff] %v231_v4  ;;  %v253_v15 = vld [vmem:[%s1918_s22 + $0x78] sm:$0xff]  ;;  %v255_v16 = vld [vmem:[%s1918_s22 + $0x80] sm:$0xff]  ;;  %v257_v17 = vld [vmem:[%s1918_s22 + $0x88] sm:$0xff] }
  0x16   : > { %234 = vst [vmem:[%s1923_s23 + $0x28] sm:$0xff] %v233_v5  ;;  %v259_v18 = vld [vmem:[%s1918_s22 + $0x240] sm:$0xff]  ;;  %v261_v19 = vld [vmem:[%s1918_s22 + $0x248] sm:$0xff]  ;;  %v263_v20 = vld [vmem:[%s1918_s22 + $0x250] sm:$0xff] }
  0x17   : > { %236 = vst [vmem:[%s1923_s23 + $0x30] sm:$0xff] %v235_v6  ;;  %v265_v21 = vld [vmem:[%s1918_s22 + $0x258] sm:$0xff]  ;;  %v267_v22 = vld [vmem:[%s1918_s22 + $0x260] sm:$0xff]  ;;  %v269_v23 = vld [vmem:[%s1918_s22 + $0x268] sm:$0xff] }
  0x18   : > { %238 = vst [vmem:[%s1923_s23 + $0x38] sm:$0xff] %v237_v7  ;;  %v271_v24 = vld [vmem:[%s1918_s22 + $0x270] sm:$0xff]  ;;  %v273_v25 = vld [vmem:[%s1918_s22 + $0x278] sm:$0xff]  ;;  %v275_v26 = vld [vmem:[%s1918_s22 + $0x280] sm:$0xff] }
  0x19   : > { %240 = vst [vmem:[%s1923_s23 + $0x40] sm:$0xff] %v239_v8  ;;  %v277_v27 = vld [vmem:[%s1918_s22 + $0x288] sm:$0xff]  ;;  %v279_v28 = vld [vmem:[%s1918_s22 + $0x290] sm:$0xff]  ;;  %v281_v29 = vld [vmem:[%s1918_s22 + $0x298] sm:$0xff] }
  0x1a   : > { %242 = vst [vmem:[%s1923_s23 + $0x48] sm:$0xff] %v241_v9  ;;  %v283_v30 = vld [vmem:[%s1918_s22 + $0x2a0] sm:$0xff]  ;;  %v285_v31 = vld [vmem:[%s1918_s22 + $0x2a8] sm:$0xff]  ;;  %v287_v32 = vld [vmem:[%s1918_s22 + $0x2b0] sm:$0xff] }
  0x1b   : > { %244 = vst [vmem:[%s1923_s23 + $0x50] sm:$0xff] %v243_v10  ;;  %v289_v33 = vld [vmem:[%s1918_s22 + $0x2b8] sm:$0xff]  ;;  %v291_v34 = vld [vmem:[%s1918_s22 + $0x2c0] sm:$0xff]  ;;  %v293_v35 = vld [vmem:[%s1918_s22 + $0x2c8] sm:$0xff] }
  0x1c   : > { %246 = vst [vmem:[%s1923_s23 + $0x58] sm:$0xff] %v245_v11 }
  0x1d   : > { %248 = vst [vmem:[%s1923_s23 + $0x60] sm:$0xff] %v247_v12 }
  0x1e   : > { %250 = vst [vmem:[%s1923_s23 + $0x68] sm:$0xff] %v249_v13 }
  0x1f   : > { %252 = vst [vmem:[%s1923_s23 + $0x70] sm:$0xff] %v251_v14 }
  0x20   : > { %254 = vst [vmem:[%s1923_s23 + $0x78] sm:$0xff] %v253_v15 }
  0x21   : > { %256 = vst [vmem:[%s1923_s23 + $0x80] sm:$0xff] %v255_v16 }
  0x22   : > { %258 = vst [vmem:[%s1923_s23 + $0x88] sm:$0xff] %v257_v17 }
  0x23   : > { %260 = vst [vmem:[%s1923_s23 + $0x90] sm:$0xff] %v259_v18 }
  0x24   : > { %262 = vst [vmem:[%s1923_s23 + $0x98] sm:$0xff] %v261_v19 }
  0x25   : > { %264 = vst [vmem:[%s1923_s23 + $0xa0] sm:$0xff] %v263_v20 }
  0x26   : > { %266 = vst [vmem:[%s1923_s23 + $0xa8] sm:$0xff] %v265_v21 }
  0x27   : > { %268 = vst [vmem:[%s1923_s23 + $0xb0] sm:$0xff] %v267_v22 }
  0x28   : > { %270 = vst [vmem:[%s1923_s23 + $0xb8] sm:$0xff] %v269_v23 }
  0x29   : > { %272 = vst [vmem:[%s1923_s23 + $0xc0] sm:$0xff] %v271_v24 }
  0x2a   : > { %274 = vst [vmem:[%s1923_s23 + $0xc8] sm:$0xff] %v273_v25 }
  0x2b   : > { %276 = vst [vmem:[%s1923_s23 + $0xd0] sm:$0xff] %v275_v26 }
  0x2c   : > { %278 = vst [vmem:[%s1923_s23 + $0xd8] sm:$0xff] %v277_v27 }
  0x2d   : > { %280 = vst [vmem:[%s1923_s23 + $0xe0] sm:$0xff] %v279_v28 }
  0x2e   : > { %282 = vst [vmem:[%s1923_s23 + $0xe8] sm:$0xff] %v281_v29 }
  0x2f   : > { %284 = vst [vmem:[%s1923_s23 + $0xf0] sm:$0xff] %v283_v30 }
  0x30   : > { %286 = vst [vmem:[%s1923_s23 + $0xf8] sm:$0xff] %v285_v31 }
  0x31   : > { %288 = vst [vmem:[%s1923_s23 + $0x100] sm:$0xff] %v287_v32 }
  0x32   : > { %290 = vst [vmem:[%s1923_s23 + $0x108] sm:$0xff] %v289_v33 }
  0x33   : > { %292 = vst [vmem:[%s1923_s23 + $0x110] sm:$0xff] %v291_v34 }
  0x34   : > { %294 = vst [vmem:[%s1923_s23 + $0x118] sm:$0xff] %v293_v35 }
  0x35 PF: > { %p1674_p5 = scmp.ge.s32.totalorder %s1865_s11, 1  ;;  %p299_p6 = scmp.lt.s32.totalorder %s1865_s11, 5 }
  0x37   : > { %p300_p7 = pnand %p1674_p5, %p299_p6 }
  0x39   : > { %303 = sbr.rel (%p300_p7) target bundleno = 758 (0x2f6), region = 62 }
  0x3e   : > { %vm440_vm0 = vcmask 1043456   ;;  %s334_s24 = smul.u32 18, %s1669_s12  ;;  %v1867_v36 = vmov 1.0   ;;  %vm385_vm1 = vcmask 556032   ;;  %v1868_v1 = vmov 0   ;;  %s306_s29 = sand.u32 1, %s1857_s9  }
  0x3f   : > { %444 = vmatpush.msra.mxu0 %v1867_v36  ;;  %1679 = vmatpush.msk.msra.mxu1 %vm440_vm0, %v1867_v36  ;;  %s1741_s30 = smul.u32 288, %s306_s29 }
  0x40   : > { %p335_p8 = scmp.lt.s32.totalorder %s334_s24, 71  ;;  %820 = vmatpush.msra.mxu2 %v1867_v36  ;;  %1698 = vmatpush.msk.msra.mxu3 %vm440_vm0, %v1867_v36 }
  0x41   : > { %445 = vmatpush.msra.mxu0 %v1867_v36  ;;  %523 = vmatpush.msra.mxu1 %v1867_v36  ;;  %s2279_s3 = scalar_lea.vmem [#allocation2], %s1741_s30 }
  0x42   : > { %821 = vmatpush.msra.mxu2 %v1867_v36  ;;  %899 = vmatpush.msra.mxu3 %v1867_v36  ;;  %s2467_s24 = smov (!%p335_p8, %s334_s24), 71 }
  0x43   : > { %446 = vmatpush.msra.mxu0 %v1867_v36  ;;  %524 = vmatpush.msra.mxu1 %v1867_v36  ;;  %s1738_s25 = sshll.u32 %s2467_s24, 4 }
  0x44   : > { %822 = vmatpush.msra.mxu2 %v1867_v36  ;;  %900 = vmatpush.msra.mxu3 %v1867_v36  ;;  %s2006_s28 = scalar_lea.vmem %s2457_s0, %s1738_s25  ;;  %s2342_s6 = scalar_lea.vmem %s2459_s2, %s1738_s25 }
  0x45   : > { %447 = vmatpush.msra.mxu0 %v1867_v36  ;;  %525 = vmatpush.msra.mxu1 %v1867_v36  ;;  %v2009_v37 = vld [vmem:[%s2006_s28 + $0x8] sm:$0xff]  ;;  %v2014_v38 = vld [vmem:[%s2006_s28 + $0x18] sm:$0xff]  ;;  %v2019_v39 = vld [vmem:[%s2006_s28] sm:$0xff] }
  0x46   : > { %823 = vmatpush.msra.mxu2 %v1867_v36  ;;  %901 = vmatpush.msra.mxu3 %v1867_v36  ;;  %v2022_v40 = vld [vmem:[%s2006_s28 + $0x28] sm:$0xff]  ;;  %v2028_v41 = vld [vmem:[%s2006_s28 + $0x10] sm:$0xff]  ;;  %v2031_v42 = vld [vmem:[%s2006_s28 + $0x38] sm:$0xff] }
  0x47   : > { %448 = vmatpush.msra.mxu0 %v1867_v36  ;;  %526 = vmatpush.msra.mxu1 %v1867_v36  ;;  %v2037_v43 = vld [vmem:[%s2006_s28 + $0x20] sm:$0xff]  ;;  %v2040_v44 = vld [vmem:[%s2006_s28 + $0x48] sm:$0xff]  ;;  %v2046_v45 = vld [vmem:[%s2006_s28 + $0x30] sm:$0xff] }
  0x48   : > { %824 = vmatpush.msra.mxu2 %v1867_v36  ;;  %902 = vmatpush.msra.mxu3 %v1867_v36  ;;  %v2049_v46 = vld [vmem:[%s2006_s28 + $0x58] sm:$0xff]  ;;  %v2055_v47 = vld [vmem:[%s2006_s28 + $0x40] sm:$0xff]  ;;  %v2058_v48 = vld [vmem:[%s2006_s28 + $0x68] sm:$0xff] }
  0x49   : > { %449 = vmatpush.msra.mxu0 %v1867_v36  ;;  %527 = vmatpush.msra.mxu1 %v1867_v36  ;;  %v2064_v49 = vld [vmem:[%s2006_s28 + $0x50] sm:$0xff]  ;;  %v2067_v50 = vld [vmem:[%s2006_s28 + $0x78] sm:$0xff]  ;;  %v2073_v51 = vld [vmem:[%s2006_s28 + $0x60] sm:$0xff] }
  0x4a   : > { %825 = vmatpush.msra.mxu2 %v1867_v36  ;;  %903 = vmatpush.msra.mxu3 %v1867_v36  ;;  %v2076_v52 = vld [vmem:[%s2006_s28 + $0x88] sm:$0xff]  ;;  %v2082_v53 = vld [vmem:[%s2006_s28 + $0x70] sm:$0xff]  ;;  %v2085_v54 = vld [vmem:[%s2006_s28 + $0x98] sm:$0xff] }
  0x4b   : > { %450 = vmatpush.msra.mxu0 %v1867_v36  ;;  %528 = vmatpush.msra.mxu1 %v1867_v36  ;;  %v2091_v55 = vld [vmem:[%s2006_s28 + $0x80] sm:$0xff]  ;;  %v2094_v56 = vld [vmem:[%s2006_s28 + $0xa8] sm:$0xff]  ;;  %v2100_v57 = vld [vmem:[%s2006_s28 + $0x90] sm:$0xff] }
  0x4c   : > { %826 = vmatpush.msra.mxu2 %v1867_v36  ;;  %904 = vmatpush.msra.mxu3 %v1867_v36  ;;  %v2103_v58 = vld [vmem:[%s2006_s28 + $0xb8] sm:$0xff]  ;;  %v2109_v59 = vld [vmem:[%s2006_s28 + $0xa0] sm:$0xff]  ;;  %v2112_v60 = vld [vmem:[%s2006_s28 + $0xc8] sm:$0xff] }
  0x4d   : > { %451 = vmatpush.msra.mxu0 %v1867_v36  ;;  %529 = vmatpush.msra.mxu1 %v1867_v36  ;;  %v2118_v61 = vld [vmem:[%s2006_s28 + $0xb0] sm:$0xff]  ;;  %v2121_v62 = vld [vmem:[%s2006_s28 + $0xd8] sm:$0xff]  ;;  %v2127_v63 = vld [vmem:[%s2006_s28 + $0xc0] sm:$0xff] }
  0x4e   : > { %827 = vmatpush.msra.mxu2 %v1867_v36  ;;  %905 = vmatpush.msra.mxu3 %v1867_v36  ;;  %v2130_v0 = vld [vmem:[%s2006_s28 + $0xe8] sm:$0xff]  ;;  %v2136_v2 = vld [vmem:[%s2006_s28 + $0xd0] sm:$0xff]  ;;  %v2139_v3 = vld [vmem:[%s2006_s28 + $0xf8] sm:$0xff] }
  0x4f   : > { %452 = vmatpush.msra.mxu0 %v1867_v36  ;;  %530 = vmatpush.msra.mxu1 %v1867_v36  ;;  %v2145_v4 = vld [vmem:[%s2006_s28 + $0xe0] sm:$0xff]  ;;  %v2148_v6 = vld [vmem:[%s2006_s28 + $0x108] sm:$0xff]  ;;  %v2154_v7 = vld [vmem:[%s2006_s28 + $0xf0] sm:$0xff] }
  0x50   : > { %1680 = vmatmul.msk.f32.vlgmr.msra.gmra.mxu1 %vm385_vm1, %v2009_v37  ;;  %828 = vmatpush.msra.mxu2 %v1867_v36  ;;  %v2157_v9 = vld [vmem:[%s2006_s28 + $0x118] sm:$0xff]  ;;  %v2163_v11 = vld [vmem:[%s2006_s28 + $0x100] sm:$0xff]  ;;  %v2170_v16 = vld [vmem:[%s2006_s28 + $0x110] sm:$0xff] }
  0x51   : > { %453 = vmatpush.msra.mxu0 %v1867_v36  ;;  %906 = vmatpush.msra.mxu3 %v1867_v36 }
  0x52   : > { %829 = vmatpush.msra.mxu2 %v1867_v36  ;;  %1768 = vset.pattern.permute.xlu0 %v1868_v1 }
  0x53   : > { %454 = vmatpush.msra.mxu0 %v1867_v36  ;;  %1769 = vset.pattern.permute.xlu1 %v1868_v1 }
  0x54   : > { %830 = vmatpush.msra.mxu2 %v1867_v36  ;;  %1770 = vset.pattern.permute.xlu2 %v1868_v1 }
  0x55   : > { %455 = vmatpush.msra.mxu0 %v1867_v36 }
  0x56   : > { %831 = vmatpush.msra.mxu2 %v1867_v36 }
  0x57   : > { %456 = vmatpush.msra.mxu0 %v1867_v36 }
  0x58   : > { %1681 = vmatmul.msk.f32.gmra.mxu1 %vm385_vm1, %v2014_v38  ;;  %832 = vmatpush.msra.mxu2 %v1867_v36 }
  0x59   : > { %457 = vmatpush.msra.mxu0 %v1867_v36 }
  0x5a   : > { %833 = vmatpush.msra.mxu2 %v1867_v36 }
  0x5b   : > { %458 = vmatpush.msra.mxu0 %v1867_v36 }
  0x5c   : > { %834 = vmatpush.msra.mxu2 %v1867_v36 }
  0x5d   : > { %459 = vmatpush.msra.mxu0 %v1867_v36 }
  0x5e   : > { %460 = vmatmul.f32.vlgmr.msra.gmra.mxu0 %v2019_v39  ;;  %835 = vmatpush.msra.mxu2 %v1867_v36 }
  0x60   : > { %1682 = vmatmul.msk.f32.gmra.mxu1 %vm385_vm1, %v2022_v40 }
  0x66   : > { %463 = vmatmul.f32.gmra.mxu0 %v2028_v41 }
  0x68   : > { %1683 = vmatmul.msk.f32.gmra.mxu1 %vm385_vm1, %v2031_v42 }
  0x6e   : > { %466 = vmatmul.f32.gmra.mxu0 %v2037_v43 }
  0x70   : > { %1684 = vmatmul.msk.f32.gmra.mxu1 %vm385_vm1, %v2040_v44 }
  0x76   : > { %469 = vmatmul.f32.gmra.mxu0 %v2046_v45 }
  0x78   : > { %1685 = vmatmul.msk.f32.gmra.mxu1 %vm385_vm1, %v2049_v46 }
  0x7e   : > { %472 = vmatmul.f32.gmra.mxu0 %v2055_v47 }
  0x80   : > { %1686 = vmatmul.msk.f32.gmra.mxu1 %vm385_vm1, %v2058_v48 }
  0x86   : > { %475 = vmatmul.f32.gmra.mxu0 %v2064_v49 }
  0x88   : > { %1687 = vmatmul.msk.f32.gmra.mxu1 %vm385_vm1, %v2067_v50 }
  0x8e   : > { %478 = vmatmul.f32.gmra.mxu0 %v2073_v51 }
  0x90   : > { %1688 = vmatmul.msk.f32.gmra.mxu1 %vm385_vm1, %v2076_v52 }
  0x96   : > { %481 = vmatmul.f32.gmra.mxu0 %v2082_v53 }
  0x98   : > { %1689 = vmatmul.msk.f32.gmra.mxu1 %vm385_vm1, %v2085_v54 }
  0x9e   : > { %484 = vmatmul.f32.gmra.mxu0 %v2091_v55 }
  0xa0   : > { %1690 = vmatmul.msk.f32.gmra.mxu1 %vm385_vm1, %v2094_v56 }
  0xa6   : > { %487 = vmatmul.f32.gmra.mxu0 %v2100_v57 }
  0xa8   : > { %1691 = vmatmul.msk.f32.gmra.mxu1 %vm385_vm1, %v2103_v58 }
  0xae   : > { %490 = vmatmul.f32.gmra.mxu0 %v2109_v59 }
  0xb0   : > { %1692 = vmatmul.msk.f32.gmra.mxu1 %vm385_vm1, %v2112_v60 }
  0xb6   : > { %493 = vmatmul.f32.gmra.mxu0 %v2118_v61 }
  0xb8   : > { %1693 = vmatmul.msk.f32.gmra.mxu1 %vm385_vm1, %v2121_v62 }
  0xbe   : > { %496 = vmatmul.f32.gmra.mxu0 %v2127_v63 }
  0xc0   : > { %1694 = vmatmul.msk.f32.gmra.mxu1 %vm385_vm1, %v2130_v0 }
  0xc6   : > { %499 = vmatmul.f32.gmra.mxu0 %v2136_v2 }
  0xc8   : > { %1695 = vmatmul.msk.f32.gmra.mxu1 %vm385_vm1, %v2139_v3 }
  0xcd   : > { %v532_v5 = vpop.f32.mrf.mxu1 }
  0xce   : > { %502 = vmatmul.f32.gmra.mxu0 %v2145_v4 }
  0xd0   : > { %1696 = vmatmul.msk.f32.gmra.mxu1 %vm385_vm1, %v2148_v6 }
  0xd5   : > { %v535_v8 = vpop.f32.mrf.mxu1 }
  0xd6   : > { %505 = vmatmul.f32.gmra.mxu0 %v2154_v7 }
  0xd8   : > { %1697 = vmatmul.msk.f32.gmra.mxu1 %vm385_vm1, %v2157_v9 }
  0xdb   : > { %v461_v10 = vpop.f32.mrf.mxu0 }
  0xdc   : > { %v533_v12 = vadd.f32 %v532_v5, %v461_v10 }
  0xdd   : > { %v538_v13 = vpop.f32.mrf.mxu1 }
  0xde   : > { %v2165_v14 = vmul.f32 0.0051020407, %v533_v12  ;;  %508 = vmatmul.f32.gmra.mxu0 %v2163_v11 }
  0xe0   : > { %606 = vperm.xlu0 %1768, %v2165_v14  }
  0xe3   : > { %v464_v15 = vpop.f32.mrf.mxu0 }
  0xe4   : > { %v536_v17 = vadd.f32 %v535_v8, %v464_v15 }
  0xe5   : > { %v541_v18 = vpop.f32.mrf.mxu1 }
  0xe6   : > { %v2172_v19 = vmul.f32 0.0051020407, %v536_v17  ;;  %511 = vmatmul.f32.gmra.mxu0 %v2170_v16 }
  0xe8   : > { %611 = vperm.xlu0 %1768, %v2172_v19  }
  0xeb   : > { %v467_v20 = vpop.f32.mrf.mxu0 }
  0xec   : > { %v539_v21 = vadd.f32 %v538_v13, %v467_v20 }
  0xed   : > { %v544_v22 = vpop.f32.mrf.mxu1 }
  0xee   : > { %v2176_v23 = vmul.f32 0.0051020407, %v539_v21 }
  0xf0   : > { %616 = vperm.xlu1 %1769, %v2176_v23  }
  0xf3   : > { %v470_v24 = vpop.f32.mrf.mxu0 }
  0xf4   : > { %v542_v25 = vadd.f32 %v541_v18, %v470_v24 }
  0xf5   : > { %v547_v26 = vpop.f32.mrf.mxu1 }
  0xf6   : > { %v2179_v27 = vmul.f32 0.0051020407, %v542_v25 }
  0xf8   : > { %621 = vperm.xlu1 %1769, %v2179_v27  }
  0xfb   : > { %v473_v28 = vpop.f32.mrf.mxu0 }
  0xfc   : > { %v545_v29 = vadd.f32 %v544_v22, %v473_v28 }
  0xfd   : > { %v550_v30 = vpop.f32.mrf.mxu1 }
  0xfe   : > { %v2182_v31 = vmul.f32 0.0051020407, %v545_v29 }
 0x100   : > { %626 = vperm.xlu2 %1770, %v2182_v31  }
 0x103   : > { %v476_v32 = vpop.f32.mrf.mxu0 }
 0x104   : > { %v548_v33 = vadd.f32 %v547_v26, %v476_v32 }
 0x105   : > { %v553_v34 = vpop.f32.mrf.mxu1 }
 0x106   : > { %v2185_v35 = vmul.f32 0.0051020407, %v548_v33 }
 0x108   : > { %631 = vperm.xlu2 %1770, %v2185_v35  }
 0x10b   : > { %v479_v36 = vpop.f32.mrf.mxu0 }
 0x10c   : > { %v551_v1 = vadd.f32 %v550_v30, %v479_v36 }
 0x10d   : > { %v556_v5 = vpop.f32.mrf.mxu1 }
 0x10e   : > { %v2188_v8 = vmul.f32 0.0051020407, %v551_v1 }
 0x110   : > { %636 = vperm.xlu0 %1768, %v2188_v8  }
 0x113   : > { %v482_v10 = vpop.f32.mrf.mxu0 }
 0x114   : > { %v554_v12 = vadd.f32 %v553_v34, %v482_v10 }
 0x115   : > { %v559_v13 = vpop.f32.mrf.mxu1 }
 0x116   : > { %v2191_v15 = vmul.f32 0.0051020407, %v554_v12 }
 0x118   : > { %641 = vperm.xlu1 %1769, %v2191_v15  }
 0x11b   : > { %v485_v17 = vpop.f32.mrf.mxu0 }
 0x11c   : > { %v557_v18 = vadd.f32 %v556_v5, %v485_v17 }
 0x11d   : > { %v562_v20 = vpop.f32.mrf.mxu1 }
 0x11e   : > { %v2194_v21 = vmul.f32 0.0051020407, %v557_v18 }
 0x120   : > { %646 = vperm.xlu2 %1770, %v2194_v21  }
 0x123   : > { %v488_v22 = vpop.f32.mrf.mxu0 }
 0x124   : > { %v560_v24 = vadd.f32 %v559_v13, %v488_v22 }
 0x125   : > { %v565_v25 = vpop.f32.mrf.mxu1 }
 0x126   : > { %v2197_v26 = vmul.f32 0.0051020407, %v560_v24 }
 0x128   : > { %651 = vperm.xlu0 %1768, %v2197_v26  }
 0x12b   : > { %v491_v28 = vpop.f32.mrf.mxu0 }
 0x12c   : > { %v563_v29 = vadd.f32 %v562_v20, %v491_v28 }
 0x12d   : > { %v568_v32 = vpop.f32.mrf.mxu1 }
 0x12e   : > { %v2200_v30 = vmul.f32 0.0051020407, %v563_v29 }
 0x130   : > { %656 = vperm.xlu1 %1769, %v2200_v30  }
 0x133   : > { %v494_v33 = vpop.f32.mrf.mxu0 }
 0x134   : > { %v566_v34 = vadd.f32 %v565_v25, %v494_v33 }
 0x135   : > { %v571_v1 = vpop.f32.mrf.mxu1 }
 0x136   : > { %v2203_v36 = vmul.f32 0.0051020407, %v566_v34 }
 0x138   : > { %661 = vperm.xlu2 %1770, %v2203_v36  }
 0x13b   : > { %v497_v5 = vpop.f32.mrf.mxu0 }
 0x13c   : > { %v569_v10 = vadd.f32 %v568_v32, %v497_v5 }
 0x13d   : > { %v574_v17 = vpop.f32.mrf.mxu1 }
 0x13e   : > { %v2206_v12 = vmul.f32 0.0051020407, %v569_v10 }
 0x140   : > { %666 = vperm.xlu0 %1768, %v2206_v12  }
 0x143   : > { %v500_v13 = vpop.f32.mrf.mxu0 }
 0x144   : > { %v572_v18 = vadd.f32 %v571_v1, %v500_v13 }
 0x145   : > { %v577_v25 = vpop.f32.mrf.mxu1 }
 0x146   : > { %v2209_v20 = vmul.f32 0.0051020407, %v572_v18 }
 0x148   : > { %671 = vperm.xlu1 %1769, %v2209_v20  }
 0x14b   : > { %v503_v22 = vpop.f32.mrf.mxu0 }
 0x14c   : > { %v575_v24 = vadd.f32 %v574_v17, %v503_v22 }
 0x14d   : > { %v580_v17 = vpop.f32.mrf.mxu1 }
 0x14e   : > { %v2212_v28 = vmul.f32 0.0051020407, %v575_v24 }
 0x150   : > { %2461 = vst [vmem:[#allocation3_spill] sm:$0xff] %v2212_v28  ;;  %676 = vperm.xlu2 %1770, %v2212_v28  }
 0x152   : > { %v607_v29 = vpop.permute.xlu0 %606 }
 0x153   : > { %v694_v32 = vsub.f32 %v2019_v39, %v607_v29  ;;  %v695_v33 = vsub.f32 %v2009_v37, %v607_v29  ;;  %v506_v34 = vpop.f32.mrf.mxu0 }
 0x154   : > { %v578_v5 = vadd.f32 %v577_v25, %v506_v34 }
 0x155   : > { %v731_v10 = vmul.f32 %v695_v33, %v695_v33  ;;  %v730_v1 = vmul.f32 %v694_v32, %v694_v32  ;;  %v583_v32 = vpop.f32.mrf.mxu1 }
 0x156   : > { %v2217_v13 = vmul.f32 0.0051020407, %v578_v5 }
 0x157   : > { %836 = vmatmul.f32.vlgmr.msra.gmra.mxu2 %v730_v1  ;;  %1699 = vmatmul.msk.f32.vlgmr.msra.gmra.mxu3 %vm385_vm1, %v731_v10 }
 0x158   : > { %681 = vperm.xlu0 %1768, %v2217_v13  }
 0x15a   : > { %v612_v18 = vpop.permute.xlu0 %611 }
 0x15b   : > { %v696_v22 = vsub.f32 %v2028_v41, %v612_v18  ;;  %v697_v24 = vsub.f32 %v2014_v38, %v612_v18  ;;  %v509_v39 = vpop.f32.mrf.mxu0 }
 0x15c   : > { %v581_v28 = vadd.f32 %v580_v17, %v509_v39 }
 0x15d   : > { %v733_v37 = vmul.f32 %v697_v24, %v697_v24  ;;  %v732_v29 = vmul.f32 %v696_v22, %v696_v22  ;;  %v627_v24 = vpop.permute.xlu2 %626 }
 0x15e   : > { %v2223_v25 = vmul.f32 0.0051020407, %v581_v28 }
 0x15f   : > { %839 = vmatmul.f32.gmra.mxu2 %v732_v29  ;;  %1700 = vmatmul.msk.f32.gmra.mxu3 %vm385_vm1, %v733_v37  ;;  %v703_v37 = vsub.f32 %v2040_v44, %v627_v24 }
 0x160   : > { %686 = vperm.xlu1 %1769, %v2223_v25  }
 0x161   : > { %v739_v29 = vmul.f32 %v703_v37, %v703_v37 }
 0x162   : > { %v617_v33 = vpop.permute.xlu1 %616 }
 0x163   : > { %v698_v34 = vsub.f32 %v2037_v43, %v617_v33  ;;  %v699_v5 = vsub.f32 %v2022_v40, %v617_v33  ;;  %v512_v41 = vpop.f32.mrf.mxu0  ;;  %v702_v40 = vsub.f32 %v2055_v47, %v627_v24 }
 0x164   : > { %v584_v10 = vadd.f32 %v583_v32, %v512_v41 }
 0x165   : > { %v735_v38 = vmul.f32 %v699_v5, %v699_v5  ;;  %v734_v1 = vmul.f32 %v698_v34, %v698_v34  ;;  %v738_v32 = vmul.f32 %v702_v40, %v702_v40  ;;  %v632_v33 = vpop.permute.xlu2 %631 }
 0x166   : > { %v2229_v17 = vmul.f32 0.0051020407, %v584_v10 }
 0x167   : > { %842 = vmatmul.f32.gmra.mxu2 %v734_v1  ;;  %1701 = vmatmul.msk.f32.gmra.mxu3 %vm385_vm1, %v735_v38 }
 0x168   : > { %691 = vperm.xlu2 %1770, %v2229_v17  }
 0x16a   : > { %v622_v28 = vpop.permute.xlu1 %621 }
 0x16b   : > { %v700_v18 = vsub.f32 %v2046_v45, %v622_v28  ;;  %v701_v22 = vsub.f32 %v2031_v42, %v622_v28  ;;  %v704_v45 = vsub.f32 %v2064_v49, %v632_v33  ;;  %v705_v42 = vsub.f32 %v2049_v46, %v632_v33 }
 0x16d   : > { %v737_v43 = vmul.f32 %v701_v22, %v701_v22  ;;  %v736_v39 = vmul.f32 %v700_v18, %v700_v18  ;;  %v741_v34 = vmul.f32 %v705_v42, %v705_v42  ;;  %v740_v5 = vmul.f32 %v704_v45, %v704_v45 }
 0x16f   : > { %845 = vmatmul.f32.gmra.mxu2 %v736_v39  ;;  %1702 = vmatmul.msk.f32.gmra.mxu3 %vm385_vm1, %v737_v43 }
 0x177   : > { %848 = vmatmul.f32.gmra.mxu2 %v738_v32  ;;  %1703 = vmatmul.msk.f32.gmra.mxu3 %vm385_vm1, %v739_v29 }
 0x17a   : > { %v647_v22 = vpop.permute.xlu2 %646 }
 0x17f   : > { %851 = vmatmul.f32.gmra.mxu2 %v740_v5  ;;  %1704 = vmatmul.msk.f32.gmra.mxu3 %vm385_vm1, %v741_v34 }
 0x182   : > { %v637_v41 = vpop.permute.xlu0 %636 }
 0x183   : > { %v706_v47 = vsub.f32 %v2073_v51, %v637_v41  ;;  %v707_v44 = vsub.f32 %v2058_v48, %v637_v41  ;;  %v710_v51 = vsub.f32 %v2091_v55, %v647_v22  ;;  %v711_v48 = vsub.f32 %v2076_v52, %v647_v22 }
 0x185   : > { %v743_v10 = vmul.f32 %v707_v44, %v707_v44  ;;  %v742_v38 = vmul.f32 %v706_v47, %v706_v47  ;;  %v747_v24 = vmul.f32 %v711_v48, %v711_v48  ;;  %v746_v43 = vmul.f32 %v710_v51, %v710_v51 }
 0x187   : > { %854 = vmatmul.f32.gmra.mxu2 %v742_v38  ;;  %1705 = vmatmul.msk.f32.gmra.mxu3 %vm385_vm1, %v743_v10 }
 0x18a   : > { %v642_v1 = vpop.permute.xlu1 %641 }
 0x18b   : > { %v708_v49 = vsub.f32 %v2082_v53, %v642_v1  ;;  %v709_v46 = vsub.f32 %v2067_v50, %v642_v1 }
 0x18d   : > { %v745_v28 = vmul.f32 %v709_v46, %v709_v46  ;;  %v744_v18 = vmul.f32 %v708_v49, %v708_v49 }
 0x18f   : > { %857 = vmatmul.f32.gmra.mxu2 %v744_v18  ;;  %1706 = vmatmul.msk.f32.gmra.mxu3 %vm385_vm1, %v745_v28 }
 0x192   : > { %v662_v45 = vpop.permute.xlu2 %661 }
 0x197   : > { %860 = vmatmul.f32.gmra.mxu2 %v746_v43  ;;  %1707 = vmatmul.msk.f32.gmra.mxu3 %vm385_vm1, %v747_v24 }
 0x19a   : > { %v652_v39 = vpop.permute.xlu0 %651 }
 0x19b   : > { %v712_v53 = vsub.f32 %v2100_v57, %v652_v39  ;;  %v713_v50 = vsub.f32 %v2085_v54, %v652_v39  ;;  %v716_v57 = vsub.f32 %v2118_v61, %v662_v45  ;;  %v717_v54 = vsub.f32 %v2103_v58, %v662_v45 }
 0x19d   : > { %v749_v40 = vmul.f32 %v713_v50, %v713_v50  ;;  %v748_v37 = vmul.f32 %v712_v53, %v712_v53  ;;  %v753_v42 = vmul.f32 %v717_v54, %v717_v54  ;;  %v752_v34 = vmul.f32 %v716_v57, %v716_v57 }
 0x19f   : > { %863 = vmatmul.f32.gmra.mxu2 %v748_v37  ;;  %1708 = vmatmul.msk.f32.gmra.mxu3 %vm385_vm1, %v749_v40 }
 0x1a2   : > { %v657_v29 = vpop.permute.xlu1 %656 }
 0x1a3   : > { %v714_v55 = vsub.f32 %v2109_v59, %v657_v29  ;;  %v715_v52 = vsub.f32 %v2094_v56, %v657_v29 }
 0x1a5   : > { %v751_v32 = vmul.f32 %v715_v52, %v715_v52  ;;  %v750_v33 = vmul.f32 %v714_v55, %v714_v55 }
 0x1a7   : > { %866 = vmatmul.f32.gmra.mxu2 %v750_v33  ;;  %1709 = vmatmul.msk.f32.gmra.mxu3 %vm385_vm1, %v751_v32 }
 0x1aa   : > { %v677_v1 = vpop.permute.xlu2 %676 }
 0x1af   : > { %869 = vmatmul.f32.gmra.mxu2 %v752_v34  ;;  %1710 = vmatmul.msk.f32.gmra.mxu3 %vm385_vm1, %v753_v42 }
 0x1b2   : > { %v667_v5 = vpop.permute.xlu0 %666 }
 0x1b3   : > { %v718_v59 = vsub.f32 %v2127_v63, %v667_v5  ;;  %v719_v56 = vsub.f32 %v2112_v60, %v667_v5  ;;  %v722_v63 = vsub.f32 %v2145_v4, %v677_v1  ;;  %v723_v60 = vsub.f32 %v2130_v0, %v677_v1 }
 0x1b5   : > { %v755_v41 = vmul.f32 %v719_v56, %v719_v56  ;;  %v754_v47 = vmul.f32 %v718_v59, %v718_v59  ;;  %v759_v49 = vmul.f32 %v723_v60, %v723_v60  ;;  %v758_v46 = vmul.f32 %v722_v63, %v722_v63 }
 0x1b7   : > { %872 = vmatmul.f32.gmra.mxu2 %v754_v47  ;;  %1711 = vmatmul.msk.f32.gmra.mxu3 %vm385_vm1, %v755_v41 }
 0x1ba   : > { %v672_v44 = vpop.permute.xlu1 %671 }
 0x1bb   : > { %v720_v61 = vsub.f32 %v2136_v2, %v672_v44  ;;  %v721_v58 = vsub.f32 %v2121_v62, %v672_v44 }
 0x1bd   : > { %v757_v10 = vmul.f32 %v721_v58, %v721_v58  ;;  %v756_v38 = vmul.f32 %v720_v61, %v720_v61  ;;  %v1178_v61 = vld [vmem:[%s2279_s3] sm:$0xff] }
 0x1bf   : > { %875 = vmatmul.f32.gmra.mxu2 %v756_v38  ;;  %1712 = vmatmul.msk.f32.gmra.mxu3 %vm385_vm1, %v757_v10 }
 0x1c2   : > { %v692_v43 = vpop.permute.xlu2 %691 }
 0x1c7   : > { %878 = vmatmul.f32.gmra.mxu2 %v758_v46  ;;  %1713 = vmatmul.msk.f32.gmra.mxu3 %vm385_vm1, %v759_v49 }
 0x1ca   : > { %v682_v28 = vpop.permute.xlu0 %681 }
 0x1cb   : > { %v724_v2 = vsub.f32 %v2154_v7, %v682_v28  ;;  %v725_v62 = vsub.f32 %v2139_v3, %v682_v28  ;;  %v728_v7 = vsub.f32 %v2170_v16, %v692_v43  ;;  %v729_v3 = vsub.f32 %v2157_v9, %v692_v43 }
 0x1cd   : > { %v761_v18 = vmul.f32 %v725_v62, %v725_v62  ;;  %v760_v22 = vmul.f32 %v724_v2, %v724_v2  ;;  %v765_v40 = vmul.f32 %v729_v3, %v729_v3  ;;  %v764_v29 = vmul.f32 %v728_v7, %v728_v7 }
 0x1cf   : > { %881 = vmatmul.f32.gmra.mxu2 %v760_v22  ;;  %1714 = vmatmul.msk.f32.gmra.mxu3 %vm385_vm1, %v761_v18 }
 0x1d2   : > { %v687_v51 = vpop.permute.xlu1 %686 }
 0x1d3   : > { %v726_v4 = vsub.f32 %v2163_v11, %v687_v51  ;;  %v727_v0 = vsub.f32 %v2148_v6, %v687_v51 }
 0x1d5   : > { %v763_v48 = vmul.f32 %v727_v0, %v727_v0  ;;  %v762_v24 = vmul.f32 %v726_v4, %v726_v4  ;;  %v1179_v4 = vld [vmem:[%s2279_s3 + $0x8] sm:$0xff]  ;;  %v1717_v0 = vld [vmem:[%s2279_s3 + $0x90] sm:$0xff] }
 0x1d7   : > { %884 = vmatmul.f32.gmra.mxu2 %v762_v24  ;;  %1715 = vmatmul.msk.f32.gmra.mxu3 %vm385_vm1, %v763_v48 }
 0x1da   : > { %v837_v39 = vpop.f32.mrf.mxu2  ;;  %v908_v53 = vpop.f32.mrf.mxu3 }
 0x1db   : > { %v909_v50 = vadd.f32 %v908_v53, %v837_v39 }
 0x1dd   : > { %v962_v37 = vmul.f32 0.0051020407, %v909_v50 }
 0x1df   : > { %v980_v11 = vadd.f32 1e-05, %v962_v37  ;;  %887 = vmatmul.f32.gmra.mxu2 %v764_v29  ;;  %1716 = vmatmul.msk.f32.gmra.mxu3 %vm385_vm1, %v765_v40 }
 0x1e1   : > { %1771 = vrsqrt.f32 %v980_v11  ;;  %vm1004_vm3 = vweird.f32 %v980_v11 }
 0x1e2   : > { %v840_v6 = vpop.f32.mrf.mxu2  ;;  %v911_v55 = vpop.f32.mrf.mxu3 }
 0x1e3   : > { %v912_v52 = vadd.f32 %v911_v55, %v840_v6 }
 0x1e5   : > { %v963_v32 = vmul.f32 0.0051020407, %v912_v52  ;;  %v1180_v52 = vld [vmem:[%s2279_s3 + $0x10] sm:$0xff] }
 0x1e7   : > { %v1772_v16 = vpop.eup %1771  ;;  %v981_v33 = vadd.f32 1e-05, %v963_v32  ;;  %v1718_v32 = vld [vmem:[%s2279_s3 + $0x98] sm:$0xff] }
 0x1e8   : > { %v999_v45 = vmul.f32 %v1772_v16, %v980_v11  ;;  %vm1005_vm2 = vweird.f32 %v1772_v16 }
 0x1e9   : > { %1773 = vrsqrt.f32 %v981_v33  ;;  %vm1006_vm4 = vmor %vm1004_vm3, %vm1005_vm2  ;;  %vm1014_vm6 = vweird.f32 %v981_v33 }
 0x1ea   : > { %v1000_v9 = vmul.f32 %v1772_v16, %v999_v45  ;;  %v843_v57 = vpop.f32.mrf.mxu2  ;;  %v914_v54 = vpop.f32.mrf.mxu3 }
 0x1eb   : > { %v915_v42 = vadd.f32 %v914_v54, %v843_v57 }
 0x1ec   : > { %v1001_v34 = vmul.f32 0.5, %v1000_v9 }
 0x1ed   : > { %v964_v5 = vmul.f32 0.0051020407, %v915_v42 }
 0x1ee   : > { %v1002_v59 = vsub.f32 1.5, %v1001_v34 }
 0x1ef   : > { %v1774_v56 = vpop.eup %1773  ;;  %v982_v41 = vadd.f32 1e-05, %v964_v5 }
 0x1f0   : > { %v1009_v47 = vmul.f32 %v1774_v56, %v981_v33  ;;  %v1003_v44 = vmul.f32 %v1772_v16, %v1002_v59  ;;  %vm1015_vm5 = vweird.f32 %v1774_v56 }
 0x1f1   : > { %1775 = vrsqrt.f32 %v982_v41  ;;  %vm1016_vm7 = vmor %vm1014_vm6, %vm1015_vm5  ;;  %vm1024_vm9 = vweird.f32 %v982_v41 }
 0x1f2   : > { %v1010_v58 = vmul.f32 %v1774_v56, %v1009_v47  ;;  %v846_v10 = vpop.f32.mrf.mxu2  ;;  %v917_v38 = vpop.f32.mrf.mxu3  ;;  %v1007_v1 = vsel %vm1006_vm4, %v1772_v16, %v1003_v44  ;;  %v1719_v44 = vld [vmem:[%s2279_s3 + $0xa0] sm:$0xff] }
 0x1f3   : > { %v918_v63 = vadd.f32 %v917_v38, %v846_v10  ;;  %v1196_v60 = vmul.f32 %v1178_v61, %v1007_v1 }
 0x1f4   : > { %v1011_v49 = vmul.f32 0.5, %v1010_v58  ;;  %v1181_v58 = vld [vmem:[%s2279_s3 + $0x18] sm:$0xff] }
 0x1f5   : > { %v965_v46 = vmul.f32 0.0051020407, %v918_v63  ;;  %1271 = vperm.xlu0 %1768, %v1196_v60   ;;  %v1233_v18 = vmul.f32 %v1196_v60, %v2165_v14 }
 0x1f6   : > { %v1012_v28 = vsub.f32 1.5, %v1011_v49 }
 0x1f7   : > { %v1776_v2 = vpop.eup %1775  ;;  %v983_v62 = vadd.f32 1e-05, %v965_v46  ;;  %v1251_v53 = vsub.f32 %v1717_v0, %v1233_v18  ;;  %v1182_v0 = vld [vmem:[%s2279_s3 + $0x20] sm:$0xff] }
 0x1f8   : > { %v1019_v22 = vmul.f32 %v1776_v2, %v982_v41  ;;  %v1013_v51 = vmul.f32 %v1774_v56, %v1012_v28  ;;  %vm1025_vm8 = vweird.f32 %v1776_v2 }
 0x1f9   : > { %1777 = vrsqrt.f32 %v983_v62  ;;  %vm1026_vm10 = vmor %vm1024_vm9, %vm1025_vm8  ;;  %vm1034_vm12 = vweird.f32 %v983_v62 }
 0x1fa   : > { %v1020_v48 = vmul.f32 %v1776_v2, %v1019_v22  ;;  %v849_v24 = vpop.f32.mrf.mxu2  ;;  %v920_v43 = vpop.f32.mrf.mxu3  ;;  %v1017_v7 = vsel %vm1016_vm7, %v1774_v56, %v1013_v51 }
 0x1fb   : > { %v921_v3 = vadd.f32 %v920_v43, %v849_v24  ;;  %v1197_v39 = vmul.f32 %v1179_v4, %v1017_v7 }
 0x1fc   : > { %v1021_v50 = vmul.f32 0.5, %v1020_v48  ;;  %v1720_v48 = vld [vmem:[%s2279_s3 + $0xa8] sm:$0xff] }
 0x1fd   : > { %v966_v40 = vmul.f32 0.0051020407, %v921_v3  ;;  %1276 = vperm.xlu1 %1769, %v1197_v39   ;;  %1397 = vperm.xlu0 %1768, %v1251_v53   ;;  %v1234_v11 = vmul.f32 %v1197_v39, %v2172_v19 }
 0x1fe   : > { %v1022_v14 = vsub.f32 1.5, %v1021_v50 }
 0x1ff   : > { %v1778_v37 = vpop.eup %1777  ;;  %v984_v29 = vadd.f32 1e-05, %v966_v40  ;;  %v1252_v42 = vsub.f32 %v1718_v32, %v1234_v11  ;;  %v1721_v32 = vld [vmem:[%s2279_s3 + $0xb0] sm:$0xff] }
 0x200   : > { %v1029_v6 = vmul.f32 %v1778_v37, %v983_v62  ;;  %v1023_v55 = vmul.f32 %v1776_v2, %v1022_v14  ;;  %vm1035_vm11 = vweird.f32 %v1778_v37 }
 0x201   : > { %1779 = vrsqrt.f32 %v984_v29  ;;  %vm1036_vm13 = vmor %vm1034_vm12, %vm1035_vm11  ;;  %vm1044_vm15 = vweird.f32 %v984_v29 }
 0x202   : > { %v1030_v16 = vmul.f32 %v1778_v37, %v1029_v6  ;;  %v852_v33 = vpop.f32.mrf.mxu2  ;;  %v923_v45 = vpop.f32.mrf.mxu3  ;;  %v1027_v9 = vsel %vm1026_vm10, %v1776_v2, %v1023_v55 }
 0x203   : > { %v924_v57 = vadd.f32 %v923_v45, %v852_v33  ;;  %v1198_v54 = vmul.f32 %v1180_v52, %v1027_v9  ;;  %v1183_v52 = vld [vmem:[%s2279_s3 + $0x28] sm:$0xff] }
 0x204   : > { %v1031_v34 = vmul.f32 0.5, %v1030_v16 }
 0x205   : > { %v967_v5 = vmul.f32 0.0051020407, %v924_v57  ;;  %1281 = vperm.xlu2 %1770, %v1198_v54   ;;  %1402 = vperm.xlu1 %1769, %v1252_v42   ;;  %v1235_v41 = vmul.f32 %v1198_v54, %v2176_v23 }
 0x206   : > { %v1032_v19 = vsub.f32 1.5, %v1031_v34 }
 0x207   : > { %v1780_v59 = vpop.eup %1779  ;;  %v985_v56 = vadd.f32 1e-05, %v967_v5  ;;  %v1253_v49 = vsub.f32 %v1719_v44, %v1235_v41 }
 0x208   : > { %v1039_v47 = vmul.f32 %v1780_v59, %v984_v29  ;;  %v1033_v61 = vmul.f32 %v1778_v37, %v1032_v19  ;;  %vm1045_vm14 = vweird.f32 %v1780_v59 }
 0x209   : > { %1781 = vrsqrt.f32 %v985_v56  ;;  %vm1046_vm0 = vmor %vm1044_vm15, %vm1045_vm14  ;;  %vm1054_vm3 = vweird.f32 %v985_v56 }
 0x20a   : > { %v1040_v10 = vmul.f32 %v1780_v59, %v1039_v47  ;;  %v855_v38 = vpop.f32.mrf.mxu2  ;;  %v926_v1 = vpop.f32.mrf.mxu3  ;;  %v1037_v63 = vsel %vm1036_vm13, %v1778_v37, %v1033_v61  ;;  %v1722_v47 = vld [vmem:[%s2279_s3 + $0xb8] sm:$0xff]  ;;  %v1184_v61 = vld [vmem:[%s2279_s3 + $0x30] sm:$0xff] }
 0x20b   : > { %v927_v60 = vadd.f32 %v926_v1, %v855_v38  ;;  %v1199_v46 = vmul.f32 %v1181_v58, %v1037_v63 }
 0x20c   : > { %v1041_v28 = vmul.f32 0.5, %v1040_v10 }
 0x20d   : > { %v968_v2 = vmul.f32 0.0051020407, %v927_v60  ;;  %1407 = vperm.xlu2 %1770, %v1253_v49   ;;  %1286 = vperm.xlu0 %1768, %v1199_v46   ;;  %v1236_v22 = vmul.f32 %v1199_v46, %v2179_v27 }
 0x20e   : > { %v1042_v23 = vsub.f32 1.5, %v1041_v28 }
 0x20f   : > { %v1782_v62 = vpop.eup %1781  ;;  %v986_v18 = vadd.f32 1e-05, %v968_v2  ;;  %v1254_v50 = vsub.f32 %v1720_v48, %v1236_v22 }
 0x210   : > { %v1049_v51 = vmul.f32 %v1782_v62, %v985_v56  ;;  %v1043_v4 = vmul.f32 %v1780_v59, %v1042_v23  ;;  %vm1055_vm2 = vweird.f32 %v1782_v62 }
 0x211   : > { %1783 = vrsqrt.f32 %v986_v18  ;;  %vm1056_vm4 = vmor %vm1054_vm3, %vm1055_vm2  ;;  %vm1064_vm6 = vweird.f32 %v986_v18 }
 0x212   : > { %v1050_v24 = vmul.f32 %v1782_v62, %v1049_v51  ;;  %v858_v43 = vpop.f32.mrf.mxu2  ;;  %v929_v7 = vpop.f32.mrf.mxu3  ;;  %v1047_v3 = vsel %vm1046_vm0, %v1780_v59, %v1043_v4  ;;  %v1185_v51 = vld [vmem:[%s2279_s3 + $0x38] sm:$0xff]  ;;  %v1723_v4 = vld [vmem:[%s2279_s3 + $0xc0] sm:$0xff] }
 0x213   : > { %v930_v39 = vadd.f32 %v929_v7, %v858_v43  ;;  %v1200_v53 = vmul.f32 %v1182_v0, %v1047_v3 }
 0x214   : > { %v1051_v40 = vmul.f32 0.5, %v1050_v24 }
 0x215   : > { %v969_v14 = vmul.f32 0.0051020407, %v930_v39  ;;  %1291 = vperm.xlu1 %1769, %v1200_v53   ;;  %1412 = vperm.xlu0 %1768, %v1254_v50   ;;  %v1237_v11 = vmul.f32 %v1200_v53, %v2182_v31 }
 0x216   : > { %v1052_v27 = vsub.f32 1.5, %v1051_v40 }
 0x217   : > { %v1784_v37 = vpop.eup %1783  ;;  %v987_v29 = vadd.f32 1e-05, %v969_v14  ;;  %v1255_v42 = vsub.f32 %v1721_v32, %v1237_v11  ;;  %v1186_v11 = vld [vmem:[%s2279_s3 + $0x40] sm:$0xff] }
 0x218   : > { %v1059_v6 = vmul.f32 %v1784_v37, %v986_v18  ;;  %v1053_v55 = vmul.f32 %v1782_v62, %v1052_v27  ;;  %vm1065_vm5 = vweird.f32 %v1784_v37 }
 0x219   : > { %1785 = vrsqrt.f32 %v987_v29  ;;  %vm1066_vm7 = vmor %vm1064_vm6, %vm1065_vm5  ;;  %vm1074_vm9 = vweird.f32 %v987_v29 }
 0x21a   : > { %v1060_v16 = vmul.f32 %v1784_v37, %v1059_v6  ;;  %v861_v33 = vpop.f32.mrf.mxu2  ;;  %v932_v45 = vpop.f32.mrf.mxu3  ;;  %v1057_v9 = vsel %vm1056_vm4, %v1782_v62, %v1053_v55  ;;  %v1724_v6 = vld [vmem:[%s2279_s3 + $0xc8] sm:$0xff] }
 0x21b   : > { %v933_v57 = vadd.f32 %v932_v45, %v861_v33  ;;  %v1201_v54 = vmul.f32 %v1183_v52, %v1057_v9 }
 0x21c   : > { %v1061_v34 = vmul.f32 0.5, %v1060_v16 }
 0x21d   : > { %v970_v5 = vmul.f32 0.0051020407, %v933_v57  ;;  %1296 = vperm.xlu2 %1770, %v1201_v54   ;;  %1417 = vperm.xlu1 %1769, %v1255_v42   ;;  %v1238_v56 = vmul.f32 %v1201_v54, %v2185_v35 }
 0x21e   : > { %v1062_v31 = vsub.f32 1.5, %v1061_v34 }
 0x21f   : > { %v1786_v19 = vpop.eup %1785  ;;  %v988_v59 = vadd.f32 1e-05, %v970_v5  ;;  %v1256_v60 = vsub.f32 %v1722_v47, %v1238_v56  ;;  %v1187_v56 = vld [vmem:[%s2279_s3 + $0x48] sm:$0xff] }
 0x220   : > { %v1069_v41 = vmul.f32 %v1786_v19, %v987_v29  ;;  %v1063_v44 = vmul.f32 %v1784_v37, %v1062_v31  ;;  %vm1075_vm8 = vweird.f32 %v1786_v19 }
 0x221   : > { %1787 = vrsqrt.f32 %v988_v59  ;;  %vm1076_vm10 = vmor %vm1074_vm9, %vm1075_vm8  ;;  %vm1084_vm12 = vweird.f32 %v988_v59 }
 0x222   : > { %v1070_v58 = vmul.f32 %v1786_v19, %v1069_v41  ;;  %v864_v10 = vpop.f32.mrf.mxu2  ;;  %v935_v38 = vpop.f32.mrf.mxu3  ;;  %v1067_v1 = vsel %vm1066_vm7, %v1784_v37, %v1063_v44 }
 0x223   : > { %v936_v63 = vadd.f32 %v935_v38, %v864_v10  ;;  %v1202_v49 = vmul.f32 %v1184_v61, %v1067_v1 }
 0x224   : > { %v1071_v46 = vmul.f32 0.5, %v1070_v58 }
 0x225   : > { %v971_v28 = vmul.f32 0.0051020407, %v936_v63  ;;  %1422 = vperm.xlu2 %1770, %v1256_v60   ;;  %1301 = vperm.xlu0 %1768, %v1202_v49   ;;  %v1239_v62 = vmul.f32 %v1202_v49, %v2188_v8 }
 0x226   : > { %v1072_v35 = vsub.f32 1.5, %v1071_v46 }
 0x227   : > { %v1788_v2 = vpop.eup %1787  ;;  %v989_v23 = vadd.f32 1e-05, %v971_v28  ;;  %v1257_v39 = vsub.f32 %v1723_v4, %v1239_v62 }
 0x228   : > { %v1079_v18 = vmul.f32 %v1788_v2, %v988_v59  ;;  %v1073_v22 = vmul.f32 %v1786_v19, %v1072_v35  ;;  %vm1085_vm11 = vweird.f32 %v1788_v2 }
 0x229   : > { %1789 = vrsqrt.f32 %v989_v23  ;;  %vm1086_vm13 = vmor %vm1084_vm12, %vm1085_vm11  ;;  %vm1094_vm15 = vweird.f32 %v989_v23 }
 0x22a   : > { %v1080_v0 = vmul.f32 %v1788_v2, %v1079_v18  ;;  %v867_v48 = vpop.f32.mrf.mxu2  ;;  %v938_v24 = vpop.f32.mrf.mxu3  ;;  %v1077_v43 = vsel %vm1076_vm10, %v1786_v19, %v1073_v22  ;;  %v1725_v19 = vld [vmem:[%s2279_s3 + $0xd0] sm:$0xff] }
 0x22b   : > { %v939_v7 = vadd.f32 %v938_v24, %v867_v48  ;;  %v1203_v3 = vmul.f32 %v1185_v51, %v1077_v43 }
 0x22c   : > { %v1081_v53 = vmul.f32 0.5, %v1080_v0 }
 0x22d   : > { %v972_v50 = vmul.f32 0.0051020407, %v939_v7  ;;  %1306 = vperm.xlu1 %1769, %v1203_v3   ;;  %1427 = vperm.xlu0 %1768, %v1257_v39   ;;  %v1240_v27 = vmul.f32 %v1203_v3, %v2191_v15 }
 0x22e   : > { %v1082_v8 = vsub.f32 1.5, %v1081_v53 }
 0x22f   : > { %v1790_v40 = vpop.eup %1789  ;;  %v990_v14 = vadd.f32 1e-05, %v972_v50  ;;  %v1258_v9 = vsub.f32 %v1724_v6, %v1240_v27 }
 0x230   : > { %v1089_v37 = vmul.f32 %v1790_v40, %v989_v23  ;;  %v1083_v29 = vmul.f32 %v1788_v2, %v1082_v8  ;;  %vm1095_vm14 = vweird.f32 %v1790_v40  ;;  %v1726_v23 = vld [vmem:[%s2279_s3 + $0xd8] sm:$0xff] }
 0x231   : > { %1791 = vrsqrt.f32 %v990_v14  ;;  %vm1096_vm0 = vmor %vm1094_vm15, %vm1095_vm14  ;;  %vm1104_vm3 = vweird.f32 %v990_v14  ;;  %v1189_v8 = vld [vmem:[%s2279_s3 + $0x58] sm:$0xff] }
 0x232   : > { %v1090_v55 = vmul.f32 %v1790_v40, %v1089_v37  ;;  %v870_v52 = vpop.f32.mrf.mxu2  ;;  %v941_v32 = vpop.f32.mrf.mxu3  ;;  %v1087_v16 = vsel %vm1086_vm13, %v1788_v2, %v1083_v29  ;;  %v1188_v2 = vld [vmem:[%s2279_s3 + $0x50] sm:$0xff] }
 0x233   : > { %v942_v33 = vadd.f32 %v941_v32, %v870_v52  ;;  %v1204_v45 = vmul.f32 %v1186_v11, %v1087_v16 }
 0x234   : > { %v1091_v57 = vmul.f32 0.5, %v1090_v55 }
 0x235   : > { %v973_v54 = vmul.f32 0.0051020407, %v942_v33  ;;  %1311 = vperm.xlu2 %1770, %v1204_v45   ;;  %1432 = vperm.xlu1 %1769, %v1258_v9   ;;  %v1241_v5 = vmul.f32 %v1204_v45, %v2194_v21 }
 0x236   : > { %v1092_v15 = vsub.f32 1.5, %v1091_v57  ;;  %v1728_v57 = vld [vmem:[%s2279_s3 + $0xe8] sm:$0xff] }
 0x237   : > { %v1792_v42 = vpop.eup %1791  ;;  %v991_v34 = vadd.f32 1e-05, %v973_v54  ;;  %v1259_v10 = vsub.f32 %v1725_v19, %v1241_v5 }
 0x238   : > { %v1099_v31 = vmul.f32 %v1792_v42, %v990_v14  ;;  %v1093_v59 = vmul.f32 %v1790_v40, %v1092_v15  ;;  %vm1105_vm2 = vweird.f32 %v1792_v42  ;;  %v1190_v15 = vld [vmem:[%s2279_s3 + $0x60] sm:$0xff] }
 0x239   : > { %1793 = vrsqrt.f32 %v991_v34  ;;  %vm1106_vm4 = vmor %vm1104_vm3, %vm1105_vm2  ;;  %vm1114_vm6 = vweird.f32 %v991_v34 }
 0x23a   : > { %v1100_v41 = vmul.f32 %v1792_v42, %v1099_v31  ;;  %v873_v47 = vpop.f32.mrf.mxu2  ;;  %v944_v44 = vpop.f32.mrf.mxu3  ;;  %v1097_v61 = vsel %vm1096_vm0, %v1790_v40, %v1093_v59  ;;  %v1727_v40 = vld [vmem:[%s2279_s3 + $0xe0] sm:$0xff] }
 0x23b   : > { %v945_v58 = vadd.f32 %v944_v44, %v873_v47  ;;  %v1205_v38 = vmul.f32 %v1187_v56, %v1097_v61 }
 0x23c   : > { %v1101_v1 = vmul.f32 0.5, %v1100_v41 }
 0x23d   : > { %v974_v63 = vmul.f32 0.0051020407, %v945_v58  ;;  %1437 = vperm.xlu2 %1770, %v1259_v10   ;;  %1316 = vperm.xlu0 %1768, %v1205_v38   ;;  %v1242_v46 = vmul.f32 %v1205_v38, %v2197_v26 }
 0x23e   : > { %v1102_v21 = vsub.f32 1.5, %v1101_v1  ;;  %v1191_v1 = vld [vmem:[%s2279_s3 + $0x68] sm:$0xff] }
 0x23f   : > { %v1794_v60 = vpop.eup %1793  ;;  %v992_v49 = vadd.f32 1e-05, %v974_v63  ;;  %v1260_v48 = vsub.f32 %v1726_v23, %v1242_v46  ;;  %v1729_v63 = vld [vmem:[%s2279_s3 + $0xf0] sm:$0xff] }
 0x240   : > { %v1109_v28 = vmul.f32 %v1794_v60, %v991_v34  ;;  %v1103_v35 = vmul.f32 %v1792_v42, %v1102_v21  ;;  %vm1115_vm5 = vweird.f32 %v1794_v60 }
 0x241   : > { %1795 = vrsqrt.f32 %v992_v49  ;;  %vm1116_vm7 = vmor %vm1114_vm6, %vm1115_vm5  ;;  %vm1124_vm9 = vweird.f32 %v992_v49 }
 0x242   : > { %v1110_v62 = vmul.f32 %v1794_v60, %v1109_v28  ;;  %v876_v18 = vpop.f32.mrf.mxu2  ;;  %v947_v22 = vpop.f32.mrf.mxu3  ;;  %v1107_v51 = vsel %vm1106_vm4, %v1792_v42, %v1103_v35 }
 0x243   : > { %v948_v4 = vadd.f32 %v947_v22, %v876_v18  ;;  %v1206_v0 = vmul.f32 %v1188_v2, %v1107_v51 }
 0x244   : > { %v1111_v24 = vmul.f32 0.5, %v1110_v62 }
 0x245   : > { %v975_v43 = vmul.f32 0.0051020407, %v948_v4  ;;  %1321 = vperm.xlu1 %1769, %v1206_v0   ;;  %1442 = vperm.xlu0 %1768, %v1260_v48   ;;  %v1243_v39 = vmul.f32 %v1206_v0, %v2200_v30  ;;  %v1730_v48 = vld [vmem:[%s2279_s3 + $0xf8] sm:$0xff] }
 0x246   : > { %v1112_v26 = vsub.f32 1.5, %v1111_v24 }
 0x247   : > { %v1796_v7 = vpop.eup %1795  ;;  %v993_v3 = vadd.f32 1e-05, %v975_v43  ;;  %v1261_v55 = vsub.f32 %v1727_v40, %v1243_v39  ;;  %v1192_v43 = vld [vmem:[%s2279_s3 + $0x70] sm:$0xff] }
 0x248   : > { %v1119_v53 = vmul.f32 %v1796_v7, %v992_v49  ;;  %v1113_v50 = vmul.f32 %v1794_v60, %v1112_v26  ;;  %vm1125_vm8 = vweird.f32 %v1796_v7 }
 0x249   : > { %1797 = vrsqrt.f32 %v993_v3  ;;  %vm1126_vm10 = vmor %vm1124_vm9, %vm1125_vm8  ;;  %vm1134_vm12 = vweird.f32 %v993_v3 }
 0x24a   : > { %v1120_v14 = vmul.f32 %v1796_v7, %v1119_v53  ;;  %v879_v27 = vpop.f32.mrf.mxu2  ;;  %v950_v37 = vpop.f32.mrf.mxu3  ;;  %v1117_v29 = vsel %vm1116_vm7, %v1794_v60, %v1113_v50 }
 0x24b   : > { %v951_v11 = vadd.f32 %v950_v37, %v879_v27  ;;  %v1207_v6 = vmul.f32 %v1189_v8, %v1117_v29  ;;  %v1808_v37 = vld [vmem:[%s2006_s28 + $0x28] sm:$0xff] }
 0x24c   : > { %v1121_v52 = vmul.f32 0.5, %v1120_v14  ;;  %v1807_v14 = vld [vmem:[%s2006_s28 + $0x20] sm:$0xff] }
 0x24d   : > { %v976_v32 = vmul.f32 0.0051020407, %v951_v11  ;;  %1326 = vperm.xlu2 %1770, %v1207_v6   ;;  %1447 = vperm.xlu1 %1769, %v1261_v55   ;;  %v1244_v45 = vmul.f32 %v1207_v6, %v2203_v36 }
 0x24e   : > { %v1122_v30 = vsub.f32 1.5, %v1121_v52 }
 0x24f   : > { %v1798_v16 = vpop.eup %1797  ;;  %v994_v33 = vadd.f32 1e-05, %v976_v32  ;;  %v1262_v59 = vsub.f32 %v1728_v57, %v1244_v45  ;;  %v2462_v45 = vld [vmem:[#allocation3_spill] sm:$0xff] }
 0x250   : > { %v1129_v9 = vmul.f32 %v1798_v16, %v993_v3  ;;  %v1123_v54 = vmul.f32 %v1796_v7, %v1122_v30  ;;  %vm1135_vm11 = vweird.f32 %v1798_v16  ;;  %v1731_v57 = vld [vmem:[%s2279_s3 + $0x100] sm:$0xff] }
 0x251   : > { %1799 = vrsqrt.f32 %v994_v33  ;;  %vm1136_vm13 = vmor %vm1134_vm12, %vm1135_vm11  ;;  %vm1144_vm15 = vweird.f32 %v994_v33 }
 0x252   : > { %v1130_v42 = vmul.f32 %v1798_v16, %v1129_v9  ;;  %v882_v34 = vpop.f32.mrf.mxu2  ;;  %v953_v5 = vpop.f32.mrf.mxu3  ;;  %v1127_v31 = vsel %vm1126_vm10, %v1796_v7, %v1123_v54 }
 0x253   : > { %v954_v19 = vadd.f32 %v953_v5, %v882_v34  ;;  %v1208_v56 = vmul.f32 %v1190_v15, %v1127_v31  ;;  %v1193_v5 = vld [vmem:[%s2279_s3 + $0x78] sm:$0xff] }
 0x254   : > { %v1131_v41 = vmul.f32 0.5, %v1130_v42 }
 0x255   : > { %v977_v47 = vmul.f32 0.0051020407, %v954_v19  ;;  %1452 = vperm.xlu2 %1770, %v1262_v59   ;;  %1331 = vperm.xlu0 %1768, %v1208_v56   ;;  %v1245_v58 = vmul.f32 %v1208_v56, %v2206_v12 }
 0x256   : > { %v1132_v36 = vsub.f32 1.5, %v1131_v41 }
 0x257   : > { %v1800_v44 = vpop.eup %1799  ;;  %v2318_v61 = vadd.f32 1e-05, %v977_v47  ;;  %v1263_v2 = vsub.f32 %v1729_v63, %v1245_v58  ;;  %v1810_v58 = vld [vmem:[%s2006_s28 + $0x8] sm:$0xff] }
 0x258   : > { %v1139_v10 = vmul.f32 %v1800_v44, %v994_v33  ;;  %v1133_v38 = vmul.f32 %v1798_v16, %v1132_v36  ;;  %vm1145_vm14 = vweird.f32 %v1800_v44  ;;  %v1809_v36 = vld [vmem:[%s2006_s28] sm:$0xff] }
 0x259   : > { %1801 = vrsqrt.f32 %v2318_v61  ;;  %vm1146_vm0 = vmor %vm1144_vm15, %vm1145_vm14  ;;  %vm1154_vm3 = vweird.f32 %v2318_v61 }
 0x25a   : > { %v1140_v21 = vmul.f32 %v1800_v44, %v1139_v10  ;;  %v885_v60 = vpop.f32.mrf.mxu2  ;;  %v956_v49 = vpop.f32.mrf.mxu3  ;;  %v1137_v46 = vsel %vm1136_vm13, %v1798_v16, %v1133_v38 }
 0x25b   : > { %v957_v28 = vadd.f32 %v956_v49, %v885_v60  ;;  %v1209_v35 = vmul.f32 %v1191_v1, %v1137_v46  ;;  %v1194_v49 = vld [vmem:[%s2279_s3 + $0x80] sm:$0xff] }
 0x25c   : > { %v1141_v23 = vmul.f32 0.5, %v1140_v21 }
 0x25d   : > { %v978_v62 = vmul.f32 0.0051020407, %v957_v28  ;;  %1336 = vperm.xlu1 %1769, %v1209_v35   ;;  %1457 = vperm.xlu0 %1768, %v1263_v2   ;;  %v1246_v4 = vmul.f32 %v1209_v35, %v2209_v20 }
 0x25e   : > { %v1142_v12 = vsub.f32 1.5, %v1141_v23 }
 0x25f   : > { %v1802_v18 = vpop.eup %1801  ;;  %v2324_v22 = vadd.f32 1e-05, %v978_v62  ;;  %v1282_v51 = vpop.permute.xlu2 %1281  ;;  %v1264_v50 = vsub.f32 %v1730_v48, %v1246_v4  ;;  %v1732_v62 = vld [vmem:[%s2279_s3 + $0x108] sm:$0xff] }
 0x260   : > { %v1149_v0 = vmul.f32 %v1802_v18, %v2318_v61  ;;  %v1143_v24 = vmul.f32 %v1800_v44, %v1142_v12  ;;  %v1363_v27 = vmul.f32 %v1807_v14, %v1282_v51  ;;  %v1364_v29 = vmul.f32 %v1808_v37, %v1282_v51  ;;  %v1813_v37 = vld [vmem:[%s2006_s28 + $0x50] sm:$0xff] }
 0x261   : > { %1803 = vrsqrt.f32 %v2324_v22  ;;  %vm1155_vm2 = vweird.f32 %v1802_v18  ;;  %vm1164_vm6 = vweird.f32 %v2324_v22 }
 0x262   : > { %v1150_v26 = vmul.f32 %v1802_v18, %v1149_v0  ;;  %v888_v7 = vpop.f32.mrf.mxu2  ;;  %v959_v3 = vpop.f32.mrf.mxu3  ;;  %v1147_v53 = vsel %vm1146_vm0, %v1800_v44, %v1143_v24  ;;  %vm1156_vm4 = vmor %vm1154_vm3, %vm1155_vm2  ;;  %v1812_v0 = vld [vmem:[%s2006_s28 + $0x18] sm:$0xff] }
 0x263   : > { %v960_v39 = vadd.f32 %v959_v3, %v888_v7  ;;  %v1210_v40 = vmul.f32 %v1192_v43, %v1147_v53  ;;  %v1195_v53 = vld [vmem:[%s2279_s3 + $0x88] sm:$0xff] }
 0x264   : > { %v1151_v8 = vmul.f32 0.5, %v1150_v26 }
 0x265   : > { %v979_v20 = vmul.f32 0.0051020407, %v960_v39  ;;  %1462 = vperm.xlu1 %1769, %v1264_v50   ;;  %1341 = vperm.xlu2 %1770, %v1210_v40   ;;  %v1247_v9 = vmul.f32 %v1210_v40, %v2462_v45  ;;  %v1733_v50 = vld [vmem:[%s2279_s3 + $0x110] sm:$0xff] }
 0x266   : > { %v1152_v6 = vsub.f32 1.5, %v1151_v8 }
 0x267   : > { %v1804_v11 = vpop.eup %1803  ;;  %v2333_v55 = vadd.f32 1e-05, %v979_v20  ;;  %v1408_v52 = vpop.permute.xlu2 %1407  ;;  %v1265_v19 = vsub.f32 %v1731_v57, %v1247_v9  ;;  %v1815_v57 = vld [vmem:[%s2006_s28 + $0x30] sm:$0xff] }
 0x268   : > { %v1272_v32 = vpop.permute.xlu0 %1271  ;;  %v1159_v30 = vmul.f32 %v1804_v11, %v2324_v22  ;;  %v1489_v16 = vadd.f32 %v1408_v52, %v1363_v27  ;;  %v1490_v33 = vadd.f32 %v1408_v52, %v1364_v29  ;;  %v1153_v34 = vmul.f32 %v1802_v18, %v1152_v6  ;;  %v1811_v22 = vld [vmem:[%s2006_s28 + $0x10] sm:$0xff] }
 0x269   : > { %1805 = vrsqrt.f32 %v2333_v55  ;;  %vm1165_vm5 = vweird.f32 %v1804_v11  ;;  %v1359_v44 = vmul.f32 %v1809_v36, %v1272_v32  ;;  %v1360_v61 = vmul.f32 %v1810_v58, %v1272_v32 }
 0x26a   : > { %v1160_v54 = vmul.f32 %v1804_v11, %v1159_v30  ;;  %v1525_v15 = vmax.f32 %v1489_v16, 0.0  ;;  %v1526_v42 = vmax.f32 %v1490_v33, 0.0  ;;  %v1157_v59 = vsel %vm1156_vm4, %v1802_v18, %v1153_v34  ;;  %vm1166_vm7 = vmor %vm1164_vm6, %vm1165_vm5  ;;  %v1734_v16 = vld [vmem:[%s2279_s3 + $0x118] sm:$0xff] }
 0x26b   : > { %v1211_v41 = vmul.f32 %v1193_v5, %v1157_v59  ;;  %vm1174_vm9 = vweird.f32 %v2333_v55 }
 0x26c   : > { %v1161_v31 = vmul.f32 0.5, %v1160_v54  ;;  %1561 = vst [vmem:[%s2342_s6 + $0x20] sm:$0xff] %v1525_v15  ;;  %v1816_v15 = vld [vmem:[%s2006_s28 + $0x38] sm:$0xff] }
 0x26d   : > { %1562 = vst.msk [vmem:[%s2342_s6 + $0x28] sm:$0xff] %vm385_vm1, %v1526_v42  ;;  %1467 = vperm.xlu2 %1770, %v1265_v19   ;;  %1346 = vperm.xlu0 %1768, %v1211_v41   ;;  %v1248_v28 = vmul.f32 %v1211_v41, %v2217_v13 }
 0x26e   : > { %v1162_v56 = vsub.f32 1.5, %v1161_v31 }
 0x26f   : > { %v1806_v47 = vpop.eup %1805  ;;  %v1277_v10 = vpop.permute.xlu1 %1276  ;;  %v1266_v24 = vsub.f32 %v1732_v62, %v1248_v28 }
 0x270   : > { %v1398_v38 = vpop.permute.xlu0 %1397  ;;  %v1169_v1 = vmul.f32 %v1806_v47, %v2333_v55  ;;  %v1163_v60 = vmul.f32 %v1804_v11, %v1162_v56  ;;  %v1361_v4 = vmul.f32 %v1811_v22, %v1277_v10  ;;  %v1362_v48 = vmul.f32 %v1812_v0, %v1277_v10  ;;  %v1817_v56 = vld [vmem:[%s2006_s28 + $0x40] sm:$0xff] }
 0x271   : > { %v1485_v63 = vadd.f32 %v1398_v38, %v1359_v44  ;;  %v1486_v21 = vadd.f32 %v1398_v38, %v1360_v61  ;;  %vm1175_vm8 = vweird.f32 %v1806_v47 }
 0x272   : > { %v1170_v46 = vmul.f32 %v1806_v47, %v1169_v1  ;;  %v1167_v23 = vsel %vm1166_vm7, %v1804_v11, %v1163_v60  ;;  %vm1176_vm10 = vmor %vm1174_vm9, %vm1175_vm8  ;;  %v1820_v60 = vld [vmem:[%s2006_s28 + $0x88] sm:$0xff] }
 0x273   : > { %v1521_v35 = vmax.f32 %v1485_v63, 0.0  ;;  %v1522_v2 = vmax.f32 %v1486_v21, 0.0  ;;  %v1212_v18 = vmul.f32 %v1194_v49, %v1167_v23  ;;  %v1819_v63 = vld [vmem:[%s2006_s28 + $0x80] sm:$0xff] }
 0x274   : > { %v1171_v12 = vmul.f32 0.5, %v1170_v46 }
 0x275   : > { %1557 = vst [vmem:[%s2342_s6] sm:$0xff] %v1521_v35  ;;  %1351 = vperm.xlu1 %1769, %v1212_v18   ;;  %1472 = vperm.xlu0 %1768, %v1266_v24   ;;  %v1249_v3 = vmul.f32 %v1212_v18, %v2223_v25  ;;  %v1814_v25 = vld [vmem:[%s2006_s28 + $0x58] sm:$0xff] }
 0x276   : > { %v1172_v51 = vsub.f32 1.5, %v1171_v12  ;;  %1558 = vst.msk [vmem:[%s2342_s6 + $0x8] sm:$0xff] %vm385_vm1, %v1522_v2  ;;  %v1821_v12 = vld [vmem:[%s2006_s28 + $0x60] sm:$0xff] }
 0x277   : > { %v1297_v13 = vpop.permute.xlu2 %1296  ;;  %v1403_v43 = vpop.permute.xlu1 %1402  ;;  %v1267_v27 = vsub.f32 %v1733_v50, %v1249_v3  ;;  %v1824_v3 = vld [vmem:[%s2006_s28 + $0x78] sm:$0xff] }
 0x278   : > { %v1487_v26 = vadd.f32 %v1403_v43, %v1361_v4  ;;  %v1488_v7 = vadd.f32 %v1403_v43, %v1362_v48  ;;  %v1173_v39 = vmul.f32 %v1806_v47, %v1172_v51  ;;  %v1369_v29 = vmul.f32 %v1813_v37, %v1297_v13  ;;  %v1822_v51 = vld [vmem:[%s2006_s28 + $0x68] sm:$0xff] }
 0x279   : > { %v1370_v11 = vmul.f32 %v1814_v25, %v1297_v13 }
 0x27a   : > { %v1523_v8 = vmax.f32 %v1487_v26, 0.0  ;;  %v1524_v40 = vmax.f32 %v1488_v7, 0.0  ;;  %v1177_v20 = vsel %vm1176_vm10, %v1806_v47, %v1173_v39  ;;  %v1818_v47 = vld [vmem:[%s2006_s28 + $0x48] sm:$0xff]  ;;  %v1823_v26 = vld [vmem:[%s2006_s28 + $0x70] sm:$0xff] }
 0x27b   : > { %v1213_v14 = vmul.f32 %v1195_v53, %v1177_v20 }
 0x27c   : > { %1559 = vst [vmem:[%s2342_s6 + $0x10] sm:$0xff] %v1523_v8 }
 0x27d   : > { %1560 = vst.msk [vmem:[%s2342_s6 + $0x18] sm:$0xff] %vm385_vm1, %v1524_v40  ;;  %1356 = vperm.xlu2 %1770, %v1213_v14   ;;  %1477 = vperm.xlu1 %1769, %v1267_v27   ;;  %v1250_v30 = vmul.f32 %v1213_v14, %v2229_v17  ;;  %v1825_v27 = vld [vmem:[%s2006_s28 + $0xb0] sm:$0xff] }
 0x27f   : > { %v1423_v6 = vpop.permute.xlu2 %1422  ;;  %v1287_v55 = vpop.permute.xlu0 %1286  ;;  %v1268_v9 = vsub.f32 %v1734_v16, %v1250_v30  ;;  %v1827_v16 = vld [vmem:[%s2006_s28 + $0x90] sm:$0xff] }
 0x280   : > { %v1495_v52 = vadd.f32 %v1423_v6, %v1369_v29  ;;  %v1496_v32 = vadd.f32 %v1423_v6, %v1370_v11  ;;  %v1365_v54 = vmul.f32 %v1815_v57, %v1287_v55  ;;  %v1366_v42 = vmul.f32 %v1816_v15, %v1287_v55  ;;  %v1826_v29 = vld [vmem:[%s2006_s28 + $0xb8] sm:$0xff] }
 0x282   : > { %v1531_v33 = vmax.f32 %v1495_v52, 0.0  ;;  %v1532_v45 = vmax.f32 %v1496_v32, 0.0 }
 0x284   : > { %1567 = vst [vmem:[%s2342_s6 + $0x50] sm:$0xff] %v1531_v33 }
 0x285   : > { %1568 = vst.msk [vmem:[%s2342_s6 + $0x58] sm:$0xff] %vm385_vm1, %v1532_v45  ;;  %1482 = vperm.xlu2 %1770, %v1268_v9   ;;  %v1828_v45 = vld [vmem:[%s2006_s28 + $0x98] sm:$0xff] }
 0x287   : > { %v1292_v34 = vpop.permute.xlu1 %1291  ;;  %v1413_v5 = vpop.permute.xlu0 %1412 }
 0x288   : > { %v1491_v31 = vadd.f32 %v1413_v5, %v1365_v54  ;;  %v1492_v17 = vadd.f32 %v1413_v5, %v1366_v42  ;;  %v1367_v41 = vmul.f32 %v1817_v56, %v1292_v34  ;;  %v1368_v36 = vmul.f32 %v1818_v47, %v1292_v34 }
 0x28a   : > { %v1527_v19 = vmax.f32 %v1491_v31, 0.0  ;;  %v1528_v59 = vmax.f32 %v1492_v17, 0.0  ;;  %v1829_v31 = vld [vmem:[%s2006_s28 + $0xa0] sm:$0xff] }
 0x28c   : > { %1563 = vst [vmem:[%s2342_s6 + $0x30] sm:$0xff] %v1527_v19  ;;  %v1830_v19 = vld [vmem:[%s2006_s28 + $0xa8] sm:$0xff] }
 0x28d   : > { %1564 = vst.msk [vmem:[%s2342_s6 + $0x38] sm:$0xff] %vm385_vm1, %v1528_v59 }
 0x28f   : > { %v1312_v44 = vpop.permute.xlu2 %1311  ;;  %v1418_v58 = vpop.permute.xlu1 %1417 }
 0x290   : > { %v1493_v61 = vadd.f32 %v1418_v58, %v1367_v41  ;;  %v1494_v10 = vadd.f32 %v1418_v58, %v1368_v36  ;;  %v1375_v21 = vmul.f32 %v1819_v63, %v1312_v44  ;;  %v1376_v49 = vmul.f32 %v1820_v60, %v1312_v44 }
 0x292   : > { %v1529_v38 = vmax.f32 %v1493_v61, 0.0  ;;  %v1530_v1 = vmax.f32 %v1494_v10, 0.0  ;;  %v1831_v61 = vld [vmem:[%s2006_s28 + $0xe0] sm:$0xff] }
 0x294   : > { %1565 = vst [vmem:[%s2342_s6 + $0x40] sm:$0xff] %v1529_v38  ;;  %v1832_v38 = vld [vmem:[%s2006_s28 + $0xe8] sm:$0xff] }
 0x295   : > { %1566 = vst.msk [vmem:[%s2342_s6 + $0x48] sm:$0xff] %vm385_vm1, %v1530_v1 }
 0x297   : > { %v1438_v46 = vpop.permute.xlu2 %1437  ;;  %v1302_v28 = vpop.permute.xlu0 %1301 }
 0x298   : > { %v1501_v35 = vadd.f32 %v1438_v46, %v1375_v21  ;;  %v1502_v2 = vadd.f32 %v1438_v46, %v1376_v49  ;;  %v1371_v18 = vmul.f32 %v1821_v12, %v1302_v28  ;;  %v1372_v22 = vmul.f32 %v1822_v51, %v1302_v28 }
 0x29a   : > { %v1537_v23 = vmax.f32 %v1501_v35, 0.0  ;;  %v1538_v62 = vmax.f32 %v1502_v2, 0.0  ;;  %v1833_v35 = vld [vmem:[%s2006_s28 + $0xc0] sm:$0xff] }
 0x29c   : > { %1573 = vst [vmem:[%s2342_s6 + $0x80] sm:$0xff] %v1537_v23  ;;  %v1834_v23 = vld [vmem:[%s2006_s28 + $0xc8] sm:$0xff] }
 0x29d   : > { %1574 = vst.msk [vmem:[%s2342_s6 + $0x88] sm:$0xff] %vm385_vm1, %v1538_v62 }
 0x29f   : > { %v1307_v4 = vpop.permute.xlu1 %1306  ;;  %v1428_v0 = vpop.permute.xlu0 %1427 }
 0x2a0   : > { %v1497_v48 = vadd.f32 %v1428_v0, %v1371_v18  ;;  %v1498_v24 = vadd.f32 %v1428_v0, %v1372_v22  ;;  %v1373_v7 = vmul.f32 %v1823_v26, %v1307_v4  ;;  %v1374_v39 = vmul.f32 %v1824_v3, %v1307_v4 }
 0x2a2   : > { %v1533_v13 = vmax.f32 %v1497_v48, 0.0  ;;  %v1534_v43 = vmax.f32 %v1498_v24, 0.0  ;;  %v1835_v48 = vld [vmem:[%s2006_s28 + $0xd0] sm:$0xff] }
 0x2a4   : > { %1569 = vst [vmem:[%s2342_s6 + $0x60] sm:$0xff] %v1533_v13  ;;  %v1836_v13 = vld [vmem:[%s2006_s28 + $0xd8] sm:$0xff] }
 0x2a5   : > { %1570 = vst.msk [vmem:[%s2342_s6 + $0x68] sm:$0xff] %vm385_vm1, %v1534_v43 }
 0x2a7   : > { %v1327_v53 = vpop.permute.xlu2 %1326  ;;  %v1433_v50 = vpop.permute.xlu1 %1432 }
 0x2a8   : > { %v1499_v8 = vadd.f32 %v1433_v50, %v1373_v7  ;;  %v1500_v40 = vadd.f32 %v1433_v50, %v1374_v39  ;;  %v1381_v37 = vmul.f32 %v1825_v27, %v1327_v53  ;;  %v1382_v25 = vmul.f32 %v1826_v29, %v1327_v53 }
 0x2aa   : > { %v1535_v20 = vmax.f32 %v1499_v8, 0.0  ;;  %v1536_v14 = vmax.f32 %v1500_v40, 0.0  ;;  %v1837_v8 = vld [vmem:[%s2006_s28 + $0x110] sm:$0xff] }
 0x2ac   : > { %1571 = vst [vmem:[%s2342_s6 + $0x70] sm:$0xff] %v1535_v20  ;;  %v1838_v20 = vld [vmem:[%s2006_s28 + $0x118] sm:$0xff] }
 0x2ad   : > { %1572 = vst.msk [vmem:[%s2342_s6 + $0x78] sm:$0xff] %vm385_vm1, %v1536_v14 }
 0x2af   : > { %v1453_v11 = vpop.permute.xlu2 %1452  ;;  %v1317_v6 = vpop.permute.xlu0 %1316 }
 0x2b0   : > { %v1507_v55 = vadd.f32 %v1453_v11, %v1381_v37  ;;  %v1508_v52 = vadd.f32 %v1453_v11, %v1382_v25  ;;  %v1377_v33 = vmul.f32 %v1827_v16, %v1317_v6  ;;  %v1378_v9 = vmul.f32 %v1828_v45, %v1317_v6 }
 0x2b2   : > { %v1543_v32 = vmax.f32 %v1507_v55, 0.0  ;;  %v1544_v30 = vmax.f32 %v1508_v52, 0.0  ;;  %v1839_v52 = vld [vmem:[%s2006_s28 + $0xf0] sm:$0xff] }
 0x2b4   : > { %1579 = vst [vmem:[%s2342_s6 + $0xb0] sm:$0xff] %v1543_v32 }
 0x2b5   : > { %1580 = vst.msk [vmem:[%s2342_s6 + $0xb8] sm:$0xff] %vm385_vm1, %v1544_v30  ;;  %v1840_v30 = vld [vmem:[%s2006_s28 + $0xf8] sm:$0xff] }
 0x2b7   : > { %v1322_v57 = vpop.permute.xlu1 %1321  ;;  %v1443_v54 = vpop.permute.xlu0 %1442 }
 0x2b8   : > { %v1503_v15 = vadd.f32 %v1443_v54, %v1377_v33  ;;  %v1504_v42 = vadd.f32 %v1443_v54, %v1378_v9  ;;  %v1379_v17 = vmul.f32 %v1829_v31, %v1322_v57  ;;  %v1380_v59 = vmul.f32 %v1830_v19, %v1322_v57 }
 0x2ba   : > { %v1539_v34 = vmax.f32 %v1503_v15, 0.0  ;;  %v1540_v5 = vmax.f32 %v1504_v42, 0.0  ;;  %v1841_v15 = vld [vmem:[%s2006_s28 + $0x100] sm:$0xff] }
 0x2bc   : > { %1575 = vst [vmem:[%s2342_s6 + $0x90] sm:$0xff] %v1539_v34  ;;  %v1842_v34 = vld [vmem:[%s2006_s28 + $0x108] sm:$0xff] }
 0x2bd   : > { %1576 = vst.msk [vmem:[%s2342_s6 + $0x98] sm:$0xff] %vm385_vm1, %v1540_v5 }
 0x2bf   : > { %v1448_v56 = vpop.permute.xlu1 %1447  ;;  %v1342_v41 = vpop.permute.xlu2 %1341 }
 0x2c0   : > { %v1505_v47 = vadd.f32 %v1448_v56, %v1379_v17  ;;  %v1506_v36 = vadd.f32 %v1448_v56, %v1380_v59  ;;  %v1387_v10 = vmul.f32 %v1831_v61, %v1342_v41  ;;  %v1388_v1 = vmul.f32 %v1832_v38, %v1342_v41 }
 0x2c2   : > { %v1541_v44 = vmax.f32 %v1505_v47, 0.0  ;;  %v1542_v58 = vmax.f32 %v1506_v36, 0.0 }
 0x2c4   : > { %1577 = vst [vmem:[%s2342_s6 + $0xa0] sm:$0xff] %v1541_v44 }
 0x2c5   : > { %1578 = vst.msk [vmem:[%s2342_s6 + $0xa8] sm:$0xff] %vm385_vm1, %v1542_v58 }
 0x2c7   : > { %v1332_v63 = vpop.permute.xlu0 %1331  ;;  %v1468_v21 = vpop.permute.xlu2 %1467 }
 0x2c8   : > { %v1513_v60 = vadd.f32 %v1468_v21, %v1387_v10  ;;  %v1514_v49 = vadd.f32 %v1468_v21, %v1388_v1  ;;  %v1383_v2 = vmul.f32 %v1833_v35, %v1332_v63  ;;  %v1384_v62 = vmul.f32 %v1834_v23, %v1332_v63 }
 0x2ca   : > { %v1549_v46 = vmax.f32 %v1513_v60, 0.0  ;;  %v1550_v28 = vmax.f32 %v1514_v49, 0.0 }
 0x2cc   : > { %1585 = vst [vmem:[%s2342_s6 + $0xe0] sm:$0xff] %v1549_v46 }
 0x2cd   : > { %1586 = vst.msk [vmem:[%s2342_s6 + $0xe8] sm:$0xff] %vm385_vm1, %v1550_v28 }
 0x2cf   : > { %v1337_v12 = vpop.permute.xlu1 %1336  ;;  %v1458_v18 = vpop.permute.xlu0 %1457 }
 0x2d0   : > { %v1509_v51 = vadd.f32 %v1458_v18, %v1383_v2  ;;  %v1510_v22 = vadd.f32 %v1458_v18, %v1384_v62  ;;  %v1385_v24 = vmul.f32 %v1835_v48, %v1337_v12  ;;  %v1386_v43 = vmul.f32 %v1836_v13, %v1337_v12 }
 0x2d2   : > { %v1545_v4 = vmax.f32 %v1509_v51, 0.0  ;;  %v1546_v0 = vmax.f32 %v1510_v22, 0.0 }
 0x2d4   : > { %1581 = vst [vmem:[%s2342_s6 + $0xc0] sm:$0xff] %v1545_v4 }
 0x2d5   : > { %1582 = vst.msk [vmem:[%s2342_s6 + $0xc8] sm:$0xff] %vm385_vm1, %v1546_v0 }
 0x2d7   : > { %v1463_v26 = vpop.permute.xlu1 %1462  ;;  %v1357_v7 = vpop.permute.xlu2 %1356 }
 0x2d8   : > { %v1511_v3 = vadd.f32 %v1463_v26, %v1385_v24  ;;  %v1512_v39 = vadd.f32 %v1463_v26, %v1386_v43  ;;  %v1393_v40 = vmul.f32 %v1837_v8, %v1357_v7  ;;  %v1394_v14 = vmul.f32 %v1838_v20, %v1357_v7 }
 0x2da   : > { %v1547_v53 = vmax.f32 %v1511_v3, 0.0  ;;  %v1548_v50 = vmax.f32 %v1512_v39, 0.0 }
 0x2dc   : > { %1583 = vst [vmem:[%s2342_s6 + $0xd0] sm:$0xff] %v1547_v53 }
 0x2dd   : > { %1584 = vst.msk [vmem:[%s2342_s6 + $0xd8] sm:$0xff] %vm385_vm1, %v1548_v50 }
 0x2df   : > { %v1483_v27 = vpop.permute.xlu2 %1482  ;;  %v1347_v25 = vpop.permute.xlu0 %1346 }
 0x2e0   : > { %v1519_v37 = vadd.f32 %v1483_v27, %v1393_v40  ;;  %v1520_v29 = vadd.f32 %v1483_v27, %v1394_v14  ;;  %v1389_v32 = vmul.f32 %v1839_v52, %v1347_v25  ;;  %v1390_v16 = vmul.f32 %v1840_v30, %v1347_v25 }
 0x2e2   : > { %v1555_v11 = vmax.f32 %v1519_v37, 0.0  ;;  %v1556_v6 = vmax.f32 %v1520_v29, 0.0 }
 0x2e4   : > { %1591 = vst [vmem:[%s2342_s6 + $0x110] sm:$0xff] %v1555_v11 }
 0x2e5   : > { %1592 = vst.msk [vmem:[%s2342_s6 + $0x118] sm:$0xff] %vm385_vm1, %v1556_v6 }
 0x2e7   : > { %v1352_v55 = vpop.permute.xlu1 %1351  ;;  %v1473_v33 = vpop.permute.xlu0 %1472 }
 0x2e8   : > { %v1515_v45 = vadd.f32 %v1473_v33, %v1389_v32  ;;  %v1516_v9 = vadd.f32 %v1473_v33, %v1390_v16  ;;  %v1391_v42 = vmul.f32 %v1841_v15, %v1352_v55  ;;  %v1392_v5 = vmul.f32 %v1842_v34, %v1352_v55 }
 0x2ea   : > { %v1551_v57 = vmax.f32 %v1515_v45, 0.0  ;;  %v1552_v54 = vmax.f32 %v1516_v9, 0.0 }
 0x2ec   : > { %1587 = vst [vmem:[%s2342_s6 + $0xf0] sm:$0xff] %v1551_v57 }
 0x2ed   : > { %1588 = vst.msk [vmem:[%s2342_s6 + $0xf8] sm:$0xff] %vm385_vm1, %v1552_v54 }
 0x2ef   : > { %v1478_v31 = vpop.permute.xlu1 %1477 }
 0x2f0   : > { %v1517_v17 = vadd.f32 %v1478_v31, %v1391_v42  ;;  %v1518_v19 = vadd.f32 %v1478_v31, %v1392_v5 }
 0x2f2   : > { %v1553_v59 = vmax.f32 %v1517_v17, 0.0  ;;  %v1554_v56 = vmax.f32 %v1518_v19, 0.0 }
 0x2f4   : > { %1589 = vst [vmem:[%s2342_s6 + $0x100] sm:$0xff] %v1553_v59 }
 0x2f5   : > { %1590 = vst.msk [vmem:[%s2342_s6 + $0x108] sm:$0xff] %vm385_vm1, %v1554_v56 }
 0x2f6 PF: > { %p9_p9 = scmp.ge.s32.totalorder %s1901_s13, 6   ;;  %s2463_s9 = smov %s1861_s10 }
 0x2f7   : > { %s2464_s10 = smov %s1910_s16  ;;  %s2465_s11 = smov %s1901_s13 }
 0x2f8   :  { %11 = sbr.rel (!%p9_p9) target bundleno = 2 (0x2), region = 105 }

</bundles_post_ra>
